<compile_context>
chip_gen: v6e
topology: v6e:2x2x1
jax: 0.10.0
libtpu: 0.0.40
codegen_flags: <defaults>
</compile_context>

<pallas_src>
import functools

import jax
import jax.numpy as jnp
from jax import lax
from jax.experimental import pallas as pl
from jax.experimental.pallas import tpu as pltpu

# Small shapes consistent with the module (scaled down).
B = 2       # batch (clips)
T = 8       # num_frame (module default 10)
H = 128     # feature / hidden size (module uses 2048)
C = 51      # num_class

BP = 8      # batch padded to the f32 sublane count
CP = 128    # classifier lanes padded to a full lane tile


# ------------------------- fused LSTM + classifier kernel -------------------
def lstm_r_kernel(x_ref, wih_ref, whh_ref, b_ref, wc_ref, bc_ref,
                  logits_ref, xproj_scr, h_scr, c_scr, hsum_scr, *, training):
    # 1) Hoisted input projection: one (T*BP, H) @ (H, 4H) MXU pass (+ bias).
    xproj_scr[...] = (
        jnp.dot(x_ref[...], wih_ref[...], preferred_element_type=jnp.float32)
        + b_ref[...])

    h_scr[...] = jnp.zeros_like(h_scr)
    c_scr[...] = jnp.zeros_like(c_scr)
    if training:
        hsum_scr[...] = jnp.zeros_like(hsum_scr)

    def sigmoid1(v):
        # sigmoid(x) = 0.5 * (tanh(0.5 x) + 1): one EUP push instead of two.
        return 0.5 * (jnp.tanh(0.5 * v) + 1.0)

    # 2) Serial recurrence, fully unrolled inside the kernel (T is tiny).
    def step(t, carry):
        row = pl.multiple_of(t * BP, BP)
        xp = xproj_scr[pl.ds(row, BP), :]                       # (BP, 4H) f32
        gates = xp + jnp.dot(h_scr[...].astype(jnp.bfloat16), whh_ref[...],
                             preferred_element_type=jnp.float32)

        i_g = sigmoid1(gates[:, 0 * H:1 * H])
        f_g = sigmoid1(gates[:, 1 * H:2 * H])
        g_g = jnp.tanh(gates[:, 2 * H:3 * H])
        o_g = sigmoid1(gates[:, 3 * H:4 * H])

        c_new = f_g * c_scr[...] + i_g * g_g
        h_new = o_g * jnp.tanh(c_new)
        c_scr[...] = c_new
        h_scr[...] = h_new
        if training:
            hsum_scr[...] += h_new
        return carry

    lax.fori_loop(0, T, step, 0, unroll=True)

    # 3) Fused classifier epilogue.
    if training:
        # mean over frames of (h_t @ W + b) == mean_t(h_t) @ W + b
        h_cls = hsum_scr[...] * (1.0 / float(T))
    else:
        h_cls = h_scr[...]                                      # last timestep
    logits_ref[...] = (
        jnp.dot(h_cls.astype(jnp.bfloat16), wc_ref[...],
                preferred_element_type=jnp.float32)
        + bc_ref[...]).astype(logits_ref.dtype)


def lstm_r_pallas(x_flat, w_ih_t, w_hh_t, bias, wc_pad, bc_pad, *, training):
    """x_flat: (T*BP, H) bf16 time-major features -> padded logits (BP, CP)."""
    kernel = functools.partial(lstm_r_kernel, training=training)
    return pl.pallas_call(
        kernel,
        out_shape=jax.ShapeDtypeStruct((BP, CP), jnp.float32),
        grid=(1,),
        in_specs=[
            pl.BlockSpec((T * BP, H), lambda i: (0, 0)),       # x (bf16)
            pl.BlockSpec((H, 4 * H), lambda i: (0, 0)),        # W_ih^T (bf16)
            pl.BlockSpec((H, 4 * H), lambda i: (0, 0)),        # W_hh^T (bf16)
            pl.BlockSpec((1, 4 * H), lambda i: (0, 0)),        # combined bias
            pl.BlockSpec((H, CP), lambda i: (0, 0)),           # W_cls^T (bf16)
            pl.BlockSpec((1, CP), lambda i: (0, 0)),           # b_cls (padded)
        ],
        out_specs=pl.BlockSpec((BP, CP), lambda i: (0, 0)),
        scratch_shapes=[
            pltpu.VMEM((T * BP, 4 * H), jnp.float32),          # x projection
            pltpu.VMEM((BP, H), jnp.float32),                  # h state
            pltpu.VMEM((BP, H), jnp.float32),                  # c state
            pltpu.VMEM((BP, H), jnp.float32),                  # sum_t h_t
        ],
        compiler_params=pltpu.CompilerParams(
            dimension_semantics=("arbitrary",)),
    )(x_flat, w_ih_t, w_hh_t, bias, wc_pad, bc_pad)


# --------------------------- full forward (glue) ----------------------------
def lstm_r_forward(x_feat_bth, params, training=False):
    """x_feat_bth: (B, T, H) per-frame ResNet features (post-backbone)."""
    # Weights pre-transposed / combined / padded / cast once in the wrapper.
    w_ih_t = params["w_ih"].T.astype(jnp.bfloat16)             # (H, 4H)
    w_hh_t = params["w_hh"].T.astype(jnp.bfloat16)             # (H, 4H)
    bias = (params["b_ih"] + params["b_hh"])[None, :]          # (1, 4H) f32

    wc_pad = jnp.zeros((H, CP), jnp.float32).at[:, :C].set(params["w_cls"].T)
    wc_pad = wc_pad.astype(jnp.bfloat16)                       # (H, CP)
    bc_pad = jnp.zeros((1, CP), jnp.float32).at[0, :C].set(params["b_cls"])

    # time-major, batch padded to BP, flattened to (T*BP, H) for one matmul.
    x_tbh = jnp.swapaxes(x_feat_bth, 0, 1)                     # (T, B, H)
    x_tbh = jnp.pad(x_tbh, ((0, 0), (0, BP - B), (0, 0)))      # (T, BP, H)
    x_flat = x_tbh.reshape(T * BP, H).astype(jnp.bfloat16)

    logits = lstm_r_pallas(x_flat, w_ih_t, w_hh_t, bias, wc_pad, bc_pad,
                           training=training)                  # (BP, CP)
    return logits[:B, :C]


# ------------------------------ pure-JAX reference --------------------------
def lstm_r_reference(x_feat_bth, params, training=False):
    w_ih, w_hh = params["w_ih"], params["w_hh"]
    b_ih, b_hh = params["b_ih"], params["b_hh"]

    def step(carry, x_t):
        h, c = carry
        gates = x_t @ w_ih.T + b_ih + h @ w_hh.T + b_hh
        i, f, g, o = jnp.split(gates, 4, axis=-1)
        i, f, o = jax.nn.sigmoid(i), jax.nn.sigmoid(f), jax.nn.sigmoid(o)
        g = jnp.tanh(g)
        c = f * c + i * g
        h = o * jnp.tanh(c)
        return (h, c), h

    h0 = jnp.zeros((B, H), jnp.float32)
    c0 = jnp.zeros((B, H), jnp.float32)
    _, hs = jax.lax.scan(step, (h0, c0), jnp.swapaxes(x_feat_bth, 0, 1))
    out = jnp.swapaxes(hs, 0, 1)                               # (B, T, H)

    if training:
        logits = out.reshape(-1, H) @ params["w_cls"].T + params["b_cls"]
        logits = logits.reshape(B, T, C)
        return jnp.mean(logits, axis=1)                        # == avg_pool2d
    else:
        return out[:, -1, :] @ params["w_cls"].T + params["b_cls"]


# ---------------------------------- main ------------------------------------
if __name__ == "__main__":
    key = jax.random.PRNGKey(0)
    kx, k1, k2, k3, k4, k5, k6 = jax.random.split(key, 7)

    stdv = 1.0 / (H ** 0.5)
    params = {
        # nn.LSTM(input_size=H, hidden_size=H) parameter shapes
        "w_ih": jax.random.uniform(k1, (4 * H, H), jnp.float32, -stdv, stdv),
        "w_hh": jax.random.uniform(k2, (4 * H, H), jnp.float32, -stdv, stdv),
        "b_ih": jax.random.uniform(k3, (4 * H,), jnp.float32, -stdv, stdv),
        "b_hh": jax.random.uniform(k4, (4 * H,), jnp.float32, -stdv, stdv),
        # nn.Linear(H, num_class)
        "w_cls": jax.random.uniform(k5, (C, H), jnp.float32, -stdv, stdv),
        "b_cls": jax.random.uniform(k6, (C,), jnp.float32, -stdv, stdv),
    }

    # Per-frame features (what resnet50-with-identity-fc would emit), (B, T, H).
    x_feat = jax.random.normal(kx, (B, T, H), jnp.float32)

    # Eval path (output[:, -1, :] -> classifier)
    logits_eval = jax.block_until_ready(
        lstm_r_forward(x_feat, params, training=False))
    ref_eval = lstm_r_reference(x_feat, params, training=False)

    # Training path (classifier over all frames -> avg_pool over num_frame)
    logits_train = jax.block_until_ready(
        lstm_r_forward(x_feat, params, training=True))
    ref_train = lstm_r_reference(x_feat, params, training=True)

    assert logits_eval.shape == (B, C) and logits_train.shape == (B, C)
    assert jnp.allclose(logits_eval, ref_eval, rtol=3e-2, atol=3e-2)
    assert jnp.allclose(logits_train, ref_train, rtol=3e-2, atol=3e-2)

    print("KERNEL_OK")
</pallas_src>

<mosaic_0001>
module attributes {stable_mosaic.version = 11 : i64} {
  func.func @lstm_r_kernel(%arg0: i32, %arg1: memref<64x128xbf16, #tpu.memory_space<vmem>>, %arg2: memref<128x512xbf16, #tpu.memory_space<vmem>>, %arg3: memref<128x512xbf16, #tpu.memory_space<vmem>>, %arg4: memref<1x512xf32, #tpu.memory_space<vmem>>, %arg5: memref<128x128xbf16, #tpu.memory_space<vmem>>, %arg6: memref<1x128xf32, #tpu.memory_space<vmem>>, %arg7: memref<8x128xf32, #tpu.memory_space<vmem>>, %arg8: memref<64x512xf32, #tpu.memory_space<vmem>>, %arg9: memref<8x128xf32, #tpu.memory_space<vmem>>, %arg10: memref<8x128xf32, #tpu.memory_space<vmem>>, %arg11: memref<8x128xf32, #tpu.memory_space<vmem>>) attributes {dimension_semantics = [#tpu.dimension_semantics<arbitrary>], iteration_bounds = array<i64: 1>, scalar_prefetch = 0 : i64, scratch_operands = 4 : i64, tpu.core_type = #tpu.core_type<tc>, window_params = [{pipeline_mode = #tpu.pipeline_mode<synchronous>, transform_indices = @transform_0, window_bounds = array<i64: 64, 128>}, {pipeline_mode = #tpu.pipeline_mode<synchronous>, transform_indices = @transform_1, window_bounds = array<i64: 128, 512>}, {pipeline_mode = #tpu.pipeline_mode<synchronous>, transform_indices = @transform_2, window_bounds = array<i64: 128, 512>}, {pipeline_mode = #tpu.pipeline_mode<synchronous>, transform_indices = @transform_3, window_bounds = array<i64: 1, 512>}, {pipeline_mode = #tpu.pipeline_mode<synchronous>, transform_indices = @transform_4, window_bounds = array<i64: 128, 128>}, {pipeline_mode = #tpu.pipeline_mode<synchronous>, transform_indices = @transform_5, window_bounds = array<i64: 1, 128>}, {pipeline_mode = #tpu.pipeline_mode<synchronous>, transform_indices = @transform_6, window_bounds = array<i64: 8, 128>}]} {
    %c0 = arith.constant 0 : index
    %c0_0 = arith.constant 0 : index
    %0 = vector.load %arg1[%c0, %c0_0] : memref<64x128xbf16, #tpu.memory_space<vmem>>, vector<64x128xbf16>
    %c0_1 = arith.constant 0 : index
    %c0_2 = arith.constant 0 : index
    %1 = vector.load %arg2[%c0_1, %c0_2] : memref<128x512xbf16, #tpu.memory_space<vmem>>, vector<128x512xbf16>
    %cst = arith.constant dense<0.000000e+00> : vector<64x512xf32>
    %2 = tpu.matmul %0, %1, %cst {dimension_numbers = #tpu.dot_dimension_numbers<[1], [0], [0], [1], [0, 0, 1, 1], [], []>} : vector<64x128xbf16>, vector<128x512xbf16>, vector<64x512xf32> -> vector<64x512xf32>
    %c0_3 = arith.constant 0 : index
    %c0_4 = arith.constant 0 : index
    %3 = vector.load %arg4[%c0_3, %c0_4] : memref<1x512xf32, #tpu.memory_space<vmem>>, vector<1x512xf32>
    %4 = vector.broadcast %3 : vector<1x512xf32> to vector<64x512xf32>
    %5 = arith.addf %2, %4 : vector<64x512xf32>
    %c0_5 = arith.constant 0 : index
    %c0_6 = arith.constant 0 : index
    %6 = vector.load %arg8[%c0_5, %c0_6] : memref<64x512xf32, #tpu.memory_space<vmem>>, vector<64x512xf32>
    tpu.vector_store %arg8[%c0_5, %c0_6], %5 {strides = array<i32>} : memref<64x512xf32, #tpu.memory_space<vmem>>, vector<64x512xf32>,
    %cst_7 = arith.constant 0.000000e+00 : f32
    %7 = vector.broadcast %cst_7 : f32 to vector<8x128xf32>
    %c0_8 = arith.constant 0 : index
    %c0_9 = arith.constant 0 : index
    %8 = vector.load %arg9[%c0_8, %c0_9] : memref<8x128xf32, #tpu.memory_space<vmem>>, vector<8x128xf32>
    tpu.vector_store %arg9[%c0_8, %c0_9], %7 {strides = array<i32>} : memref<8x128xf32, #tpu.memory_space<vmem>>, vector<8x128xf32>,
    %cst_10 = arith.constant 0.000000e+00 : f32
    %9 = vector.broadcast %cst_10 : f32 to vector<8x128xf32>
    %c0_11 = arith.constant 0 : index
    %c0_12 = arith.constant 0 : index
    %10 = vector.load %arg10[%c0_11, %c0_12] : memref<8x128xf32, #tpu.memory_space<vmem>>, vector<8x128xf32>
    tpu.vector_store %arg10[%c0_11, %c0_12], %9 {strides = array<i32>} : memref<8x128xf32, #tpu.memory_space<vmem>>, vector<8x128xf32>,
    %c0_i32 = arith.constant 0 : i32
    %c8_i32 = arith.constant 8 : i32
    %11 = arith.muli %c0_i32, %c8_i32 : i32
    %12 = tpu.assume_multiple %11, 8 : i32
    %13 = arith.index_cast %12 : i32 to index
    %c0_13 = arith.constant 0 : index
    %14 = vector.load %arg8[%13, %c0_13] : memref<64x512xf32, #tpu.memory_space<vmem>>, vector<8x512xf32>
    %c0_14 = arith.constant 0 : index
    %c0_15 = arith.constant 0 : index
    %15 = vector.load %arg9[%c0_14, %c0_15] : memref<8x128xf32, #tpu.memory_space<vmem>>, vector<8x128xf32>
    %16 = arith.truncf %15 : vector<8x128xf32> to vector<8x128xbf16>
    %c0_16 = arith.constant 0 : index
    %c0_17 = arith.constant 0 : index
    %17 = vector.load %arg3[%c0_16, %c0_17] : memref<128x512xbf16, #tpu.memory_space<vmem>>, vector<128x512xbf16>
    %cst_18 = arith.constant dense<0.000000e+00> : vector<8x512xf32>
    %18 = tpu.matmul %16, %17, %cst_18 {dimension_numbers = #tpu.dot_dimension_numbers<[1], [0], [0], [1], [0, 0, 1, 1], [], []>} : vector<8x128xbf16>, vector<128x512xbf16>, vector<8x512xf32> -> vector<8x512xf32>
    %19 = arith.addf %14, %18 : vector<8x512xf32>
    %20 = vector.extract_strided_slice %19 {offsets = [0, 0], sizes = [8, 128], strides = [1, 1]} : vector<8x512xf32> to vector<8x128xf32>
    %cst_19 = arith.constant 5.000000e-01 : f32
    %21 = vector.broadcast %cst_19 : f32 to vector<8x128xf32>
    %22 = arith.mulf %21, %20 : vector<8x128xf32>
    %23 = math.tanh %22 : vector<8x128xf32>
    %cst_20 = arith.constant 1.000000e+00 : f32
    %24 = vector.broadcast %cst_20 : f32 to vector<8x128xf32>
    %25 = arith.addf %23, %24 : vector<8x128xf32>
    %cst_21 = arith.constant 5.000000e-01 : f32
    %26 = vector.broadcast %cst_21 : f32 to vector<8x128xf32>
    %27 = arith.mulf %26, %25 : vector<8x128xf32>
    %28 = vector.extract_strided_slice %19 {offsets = [0, 128], sizes = [8, 128], strides = [1, 1]} : vector<8x512xf32> to vector<8x128xf32>
    %cst_22 = arith.constant 5.000000e-01 : f32
    %29 = vector.broadcast %cst_22 : f32 to vector<8x128xf32>
    %30 = arith.mulf %29, %28 : vector<8x128xf32>
    %31 = math.tanh %30 : vector<8x128xf32>
    %cst_23 = arith.constant 1.000000e+00 : f32
    %32 = vector.broadcast %cst_23 : f32 to vector<8x128xf32>
    %33 = arith.addf %31, %32 : vector<8x128xf32>
    %cst_24 = arith.constant 5.000000e-01 : f32
    %34 = vector.broadcast %cst_24 : f32 to vector<8x128xf32>
    %35 = arith.mulf %34, %33 : vector<8x128xf32>
    %36 = vector.extract_strided_slice %19 {offsets = [0, 256], sizes = [8, 128], strides = [1, 1]} : vector<8x512xf32> to vector<8x128xf32>
    %37 = math.tanh %36 : vector<8x128xf32>
    %38 = vector.extract_strided_slice %19 {offsets = [0, 384], sizes = [8, 128], strides = [1, 1]} : vector<8x512xf32> to vector<8x128xf32>
    %cst_25 = arith.constant 5.000000e-01 : f32
    %39 = vector.broadcast %cst_25 : f32 to vector<8x128xf32>
    %40 = arith.mulf %39, %38 : vector<8x128xf32>
    %41 = math.tanh %40 : vector<8x128xf32>
    %cst_26 = arith.constant 1.000000e+00 : f32
    %42 = vector.broadcast %cst_26 : f32 to vector<8x128xf32>
    %43 = arith.addf %41, %42 : vector<8x128xf32>
    %cst_27 = arith.constant 5.000000e-01 : f32
    %44 = vector.broadcast %cst_27 : f32 to vector<8x128xf32>
    %45 = arith.mulf %44, %43 : vector<8x128xf32>
    %c0_28 = arith.constant 0 : index
    %c0_29 = arith.constant 0 : index
    %46 = vector.load %arg10[%c0_28, %c0_29] : memref<8x128xf32, #tpu.memory_space<vmem>>, vector<8x128xf32>
    %47 = arith.mulf %35, %46 : vector<8x128xf32>
    %48 = arith.mulf %27, %37 : vector<8x128xf32>
    %49 = arith.addf %47, %48 : vector<8x128xf32>
    %50 = math.tanh %49 : vector<8x128xf32>
    %51 = arith.mulf %45, %50 : vector<8x128xf32>
    %c0_30 = arith.constant 0 : index
    %c0_31 = arith.constant 0 : index
    %52 = vector.load %arg10[%c0_30, %c0_31] : memref<8x128xf32, #tpu.memory_space<vmem>>, vector<8x128xf32>
    tpu.vector_store %arg10[%c0_30, %c0_31], %49 {strides = array<i32>} : memref<8x128xf32, #tpu.memory_space<vmem>>, vector<8x128xf32>,
    %c0_32 = arith.constant 0 : index
    %c0_33 = arith.constant 0 : index
    %53 = vector.load %arg9[%c0_32, %c0_33] : memref<8x128xf32, #tpu.memory_space<vmem>>, vector<8x128xf32>
    tpu.vector_store %arg9[%c0_32, %c0_33], %51 {strides = array<i32>} : memref<8x128xf32, #tpu.memory_space<vmem>>, vector<8x128xf32>,
    %c1_i32 = arith.constant 1 : i32
    %c8_i32_34 = arith.constant 8 : i32
    %54 = arith.muli %c1_i32, %c8_i32_34 : i32
    %55 = tpu.assume_multiple %54, 8 : i32
    %56 = arith.index_cast %55 : i32 to index
    %c0_35 = arith.constant 0 : index
    %57 = vector.load %arg8[%56, %c0_35] : memref<64x512xf32, #tpu.memory_space<vmem>>, vector<8x512xf32>
    %c0_36 = arith.constant 0 : index
    %c0_37 = arith.constant 0 : index
    %58 = vector.load %arg9[%c0_36, %c0_37] : memref<8x128xf32, #tpu.memory_space<vmem>>, vector<8x128xf32>
    %59 = arith.truncf %58 : vector<8x128xf32> to vector<8x128xbf16>
    %c0_38 = arith.constant 0 : index
    %c0_39 = arith.constant 0 : index
    %60 = vector.load %arg3[%c0_38, %c0_39] : memref<128x512xbf16, #tpu.memory_space<vmem>>, vector<128x512xbf16>
    %cst_40 = arith.constant dense<0.000000e+00> : vector<8x512xf32>
    %61 = tpu.matmul %59, %60, %cst_40 {dimension_numbers = #tpu.dot_dimension_numbers<[1], [0], [0], [1], [0, 0, 1, 1], [], []>} : vector<8x128xbf16>, vector<128x512xbf16>, vector<8x512xf32> -> vector<8x512xf32>
    %62 = arith.addf %57, %61 : vector<8x512xf32>
    %63 = vector.extract_strided_slice %62 {offsets = [0, 0], sizes = [8, 128], strides = [1, 1]} : vector<8x512xf32> to vector<8x128xf32>
    %cst_41 = arith.constant 5.000000e-01 : f32
    %64 = vector.broadcast %cst_41 : f32 to vector<8x128xf32>
    %65 = arith.mulf %64, %63 : vector<8x128xf32>
    %66 = math.tanh %65 : vector<8x128xf32>
    %cst_42 = arith.constant 1.000000e+00 : f32
    %67 = vector.broadcast %cst_42 : f32 to vector<8x128xf32>
    %68 = arith.addf %66, %67 : vector<8x128xf32>
    %cst_43 = arith.constant 5.000000e-01 : f32
    %69 = vector.broadcast %cst_43 : f32 to vector<8x128xf32>
    %70 = arith.mulf %69, %68 : vector<8x128xf32>
    %71 = vector.extract_strided_slice %62 {offsets = [0, 128], sizes = [8, 128], strides = [1, 1]} : vector<8x512xf32> to vector<8x128xf32>
    %cst_44 = arith.constant 5.000000e-01 : f32
    %72 = vector.broadcast %cst_44 : f32 to vector<8x128xf32>
    %73 = arith.mulf %72, %71 : vector<8x128xf32>
    %74 = math.tanh %73 : vector<8x128xf32>
    %cst_45 = arith.constant 1.000000e+00 : f32
    %75 = vector.broadcast %cst_45 : f32 to vector<8x128xf32>
    %76 = arith.addf %74, %75 : vector<8x128xf32>
    %cst_46 = arith.constant 5.000000e-01 : f32
    %77 = vector.broadcast %cst_46 : f32 to vector<8x128xf32>
    %78 = arith.mulf %77, %76 : vector<8x128xf32>
    %79 = vector.extract_strided_slice %62 {offsets = [0, 256], sizes = [8, 128], strides = [1, 1]} : vector<8x512xf32> to vector<8x128xf32>
    %80 = math.tanh %79 : vector<8x128xf32>
    %81 = vector.extract_strided_slice %62 {offsets = [0, 384], sizes = [8, 128], strides = [1, 1]} : vector<8x512xf32> to vector<8x128xf32>
    %cst_47 = arith.constant 5.000000e-01 : f32
    %82 = vector.broadcast %cst_47 : f32 to vector<8x128xf32>
    %83 = arith.mulf %82, %81 : vector<8x128xf32>
    %84 = math.tanh %83 : vector<8x128xf32>
    %cst_48 = arith.constant 1.000000e+00 : f32
    %85 = vector.broadcast %cst_48 : f32 to vector<8x128xf32>
    %86 = arith.addf %84, %85 : vector<8x128xf32>
    %cst_49 = arith.constant 5.000000e-01 : f32
    %87 = vector.broadcast %cst_49 : f32 to vector<8x128xf32>
    %88 = arith.mulf %87, %86 : vector<8x128xf32>
    %c0_50 = arith.constant 0 : index
    %c0_51 = arith.constant 0 : index
    %89 = vector.load %arg10[%c0_50, %c0_51] : memref<8x128xf32, #tpu.memory_space<vmem>>, vector<8x128xf32>
    %90 = arith.mulf %78, %89 : vector<8x128xf32>
    %91 = arith.mulf %70, %80 : vector<8x128xf32>
    %92 = arith.addf %90, %91 : vector<8x128xf32>
    %93 = math.tanh %92 : vector<8x128xf32>
    %94 = arith.mulf %88, %93 : vector<8x128xf32>
    %c0_52 = arith.constant 0 : index
    %c0_53 = arith.constant 0 : index
    %95 = vector.load %arg10[%c0_52, %c0_53] : memref<8x128xf32, #tpu.memory_space<vmem>>, vector<8x128xf32>
    tpu.vector_store %arg10[%c0_52, %c0_53], %92 {strides = array<i32>} : memref<8x128xf32, #tpu.memory_space<vmem>>, vector<8x128xf32>,
    %c0_54 = arith.constant 0 : index
    %c0_55 = arith.constant 0 : index
    %96 = vector.load %arg9[%c0_54, %c0_55] : memref<8x128xf32, #tpu.memory_space<vmem>>, vector<8x128xf32>
    tpu.vector_store %arg9[%c0_54, %c0_55], %94 {strides = array<i32>} : memref<8x128xf32, #tpu.memory_space<vmem>>, vector<8x128xf32>,
    %c2_i32 = arith.constant 2 : i32
    %c8_i32_56 = arith.constant 8 : i32
    %97 = arith.muli %c2_i32, %c8_i32_56 : i32
    %98 = tpu.assume_multiple %97, 8 : i32
    %99 = arith.index_cast %98 : i32 to index
    %c0_57 = arith.constant 0 : index
    %100 = vector.load %arg8[%99, %c0_57] : memref<64x512xf32, #tpu.memory_space<vmem>>, vector<8x512xf32>
    %c0_58 = arith.constant 0 : index
    %c0_59 = arith.constant 0 : index
    %101 = vector.load %arg9[%c0_58, %c0_59] : memref<8x128xf32, #tpu.memory_space<vmem>>, vector<8x128xf32>
    %102 = arith.truncf %101 : vector<8x128xf32> to vector<8x128xbf16>
    %c0_60 = arith.constant 0 : index
    %c0_61 = arith.constant 0 : index
    %103 = vector.load %arg3[%c0_60, %c0_61] : memref<128x512xbf16, #tpu.memory_space<vmem>>, vector<128x512xbf16>
    %cst_62 = arith.constant dense<0.000000e+00> : vector<8x512xf32>
    %104 = tpu.matmul %102, %103, %cst_62 {dimension_numbers = #tpu.dot_dimension_numbers<[1], [0], [0], [1], [0, 0, 1, 1], [], []>} : vector<8x128xbf16>, vector<128x512xbf16>, vector<8x512xf32> -> vector<8x512xf32>
    %105 = arith.addf %100, %104 : vector<8x512xf32>
    %106 = vector.extract_strided_slice %105 {offsets = [0, 0], sizes = [8, 128], strides = [1, 1]} : vector<8x512xf32> to vector<8x128xf32>
    %cst_63 = arith.constant 5.000000e-01 : f32
    %107 = vector.broadcast %cst_63 : f32 to vector<8x128xf32>
    %108 = arith.mulf %107, %106 : vector<8x128xf32>
    %109 = math.tanh %108 : vector<8x128xf32>
    %cst_64 = arith.constant 1.000000e+00 : f32
    %110 = vector.broadcast %cst_64 : f32 to vector<8x128xf32>
    %111 = arith.addf %109, %110 : vector<8x128xf32>
    %cst_65 = arith.constant 5.000000e-01 : f32
    %112 = vector.broadcast %cst_65 : f32 to vector<8x128xf32>
    %113 = arith.mulf %112, %111 : vector<8x128xf32>
    %114 = vector.extract_strided_slice %105 {offsets = [0, 128], sizes = [8, 128], strides = [1, 1]} : vector<8x512xf32> to vector<8x128xf32>
    %cst_66 = arith.constant 5.000000e-01 : f32
    %115 = vector.broadcast %cst_66 : f32 to vector<8x128xf32>
    %116 = arith.mulf %115, %114 : vector<8x128xf32>
    %117 = math.tanh %116 : vector<8x128xf32>
    %cst_67 = arith.constant 1.000000e+00 : f32
    %118 = vector.broadcast %cst_67 : f32 to vector<8x128xf32>
    %119 = arith.addf %117, %118 : vector<8x128xf32>
    %cst_68 = arith.constant 5.000000e-01 : f32
    %120 = vector.broadcast %cst_68 : f32 to vector<8x128xf32>
    %121 = arith.mulf %120, %119 : vector<8x128xf32>
    %122 = vector.extract_strided_slice %105 {offsets = [0, 256], sizes = [8, 128], strides = [1, 1]} : vector<8x512xf32> to vector<8x128xf32>
    %123 = math.tanh %122 : vector<8x128xf32>
    %124 = vector.extract_strided_slice %105 {offsets = [0, 384], sizes = [8, 128], strides = [1, 1]} : vector<8x512xf32> to vector<8x128xf32>
    %cst_69 = arith.constant 5.000000e-01 : f32
    %125 = vector.broadcast %cst_69 : f32 to vector<8x128xf32>
    %126 = arith.mulf %125, %124 : vector<8x128xf32>
    %127 = math.tanh %126 : vector<8x128xf32>
    %cst_70 = arith.constant 1.000000e+00 : f32
    %128 = vector.broadcast %cst_70 : f32 to vector<8x128xf32>
    %129 = arith.addf %127, %128 : vector<8x128xf32>
    %cst_71 = arith.constant 5.000000e-01 : f32
    %130 = vector.broadcast %cst_71 : f32 to vector<8x128xf32>
    %131 = arith.mulf %130, %129 : vector<8x128xf32>
    %c0_72 = arith.constant 0 : index
    %c0_73 = arith.constant 0 : index
    %132 = vector.load %arg10[%c0_72, %c0_73] : memref<8x128xf32, #tpu.memory_space<vmem>>, vector<8x128xf32>
    %133 = arith.mulf %121, %132 : vector<8x128xf32>
    %134 = arith.mulf %113, %123 : vector<8x128xf32>
    %135 = arith.addf %133, %134 : vector<8x128xf32>
    %136 = math.tanh %135 : vector<8x128xf32>
    %137 = arith.mulf %131, %136 : vector<8x128xf32>
    %c0_74 = arith.constant 0 : index
    %c0_75 = arith.constant 0 : index
    %138 = vector.load %arg10[%c0_74, %c0_75] : memref<8x128xf32, #tpu.memory_space<vmem>>, vector<8x128xf32>
    tpu.vector_store %arg10[%c0_74, %c0_75], %135 {strides = array<i32>} : memref<8x128xf32, #tpu.memory_space<vmem>>, vector<8x128xf32>,
    %c0_76 = arith.constant 0 : index
    %c0_77 = arith.constant 0 : index
    %139 = vector.load %arg9[%c0_76, %c0_77] : memref<8x128xf32, #tpu.memory_space<vmem>>, vector<8x128xf32>
    tpu.vector_store %arg9[%c0_76, %c0_77], %137 {strides = array<i32>} : memref<8x128xf32, #tpu.memory_space<vmem>>, vector<8x128xf32>,
    %c3_i32 = arith.constant 3 : i32
    %c8_i32_78 = arith.constant 8 : i32
    %140 = arith.muli %c3_i32, %c8_i32_78 : i32
    %141 = tpu.assume_multiple %140, 8 : i32
    %142 = arith.index_cast %141 : i32 to index
    %c0_79 = arith.constant 0 : index
    %143 = vector.load %arg8[%142, %c0_79] : memref<64x512xf32, #tpu.memory_space<vmem>>, vector<8x512xf32>
    %c0_80 = arith.constant 0 : index
    %c0_81 = arith.constant 0 : index
    %144 = vector.load %arg9[%c0_80, %c0_81] : memref<8x128xf32, #tpu.memory_space<vmem>>, vector<8x128xf32>
    %145 = arith.truncf %144 : vector<8x128xf32> to vector<8x128xbf16>
    %c0_82 = arith.constant 0 : index
    %c0_83 = arith.constant 0 : index
    %146 = vector.load %arg3[%c0_82, %c0_83] : memref<128x512xbf16, #tpu.memory_space<vmem>>, vector<128x512xbf16>
    %cst_84 = arith.constant dense<0.000000e+00> : vector<8x512xf32>
    %147 = tpu.matmul %145, %146, %cst_84 {dimension_numbers = #tpu.dot_dimension_numbers<[1], [0], [0], [1], [0, 0, 1, 1], [], []>} : vector<8x128xbf16>, vector<128x512xbf16>, vector<8x512xf32> -> vector<8x512xf32>
    %148 = arith.addf %143, %147 : vector<8x512xf32>
    %149 = vector.extract_strided_slice %148 {offsets = [0, 0], sizes = [8, 128], strides = [1, 1]} : vector<8x512xf32> to vector<8x128xf32>
    %cst_85 = arith.constant 5.000000e-01 : f32
    %150 = vector.broadcast %cst_85 : f32 to vector<8x128xf32>
    %151 = arith.mulf %150, %149 : vector<8x128xf32>
    %152 = math.tanh %151 : vector<8x128xf32>
    %cst_86 = arith.constant 1.000000e+00 : f32
    %153 = vector.broadcast %cst_86 : f32 to vector<8x128xf32>
    %154 = arith.addf %152, %153 : vector<8x128xf32>
    %cst_87 = arith.constant 5.000000e-01 : f32
    %155 = vector.broadcast %cst_87 : f32 to vector<8x128xf32>
    %156 = arith.mulf %155, %154 : vector<8x128xf32>
    %157 = vector.extract_strided_slice %148 {offsets = [0, 128], sizes = [8, 128], strides = [1, 1]} : vector<8x512xf32> to vector<8x128xf32>
    %cst_88 = arith.constant 5.000000e-01 : f32
    %158 = vector.broadcast %cst_88 : f32 to vector<8x128xf32>
    %159 = arith.mulf %158, %157 : vector<8x128xf32>
    %160 = math.tanh %159 : vector<8x128xf32>
    %cst_89 = arith.constant 1.000000e+00 : f32
    %161 = vector.broadcast %cst_89 : f32 to vector<8x128xf32>
    %162 = arith.addf %160, %161 : vector<8x128xf32>
    %cst_90 = arith.constant 5.000000e-01 : f32
    %163 = vector.broadcast %cst_90 : f32 to vector<8x128xf32>
    %164 = arith.mulf %163, %162 : vector<8x128xf32>
    %165 = vector.extract_strided_slice %148 {offsets = [0, 256], sizes = [8, 128], strides = [1, 1]} : vector<8x512xf32> to vector<8x128xf32>
    %166 = math.tanh %165 : vector<8x128xf32>
    %167 = vector.extract_strided_slice %148 {offsets = [0, 384], sizes = [8, 128], strides = [1, 1]} : vector<8x512xf32> to vector<8x128xf32>
    %cst_91 = arith.constant 5.000000e-01 : f32
    %168 = vector.broadcast %cst_91 : f32 to vector<8x128xf32>
    %169 = arith.mulf %168, %167 : vector<8x128xf32>
    %170 = math.tanh %169 : vector<8x128xf32>
    %cst_92 = arith.constant 1.000000e+00 : f32
    %171 = vector.broadcast %cst_92 : f32 to vector<8x128xf32>
    %172 = arith.addf %170, %171 : vector<8x128xf32>
    %cst_93 = arith.constant 5.000000e-01 : f32
    %173 = vector.broadcast %cst_93 : f32 to vector<8x128xf32>
    %174 = arith.mulf %173, %172 : vector<8x128xf32>
    %c0_94 = arith.constant 0 : index
    %c0_95 = arith.constant 0 : index
    %175 = vector.load %arg10[%c0_94, %c0_95] : memref<8x128xf32, #tpu.memory_space<vmem>>, vector<8x128xf32>
    %176 = arith.mulf %164, %175 : vector<8x128xf32>
    %177 = arith.mulf %156, %166 : vector<8x128xf32>
    %178 = arith.addf %176, %177 : vector<8x128xf32>
    %179 = math.tanh %178 : vector<8x128xf32>
    %180 = arith.mulf %174, %179 : vector<8x128xf32>
    %c0_96 = arith.constant 0 : index
    %c0_97 = arith.constant 0 : index
    %181 = vector.load %arg10[%c0_96, %c0_97] : memref<8x128xf32, #tpu.memory_space<vmem>>, vector<8x128xf32>
    tpu.vector_store %arg10[%c0_96, %c0_97], %178 {strides = array<i32>} : memref<8x128xf32, #tpu.memory_space<vmem>>, vector<8x128xf32>,
    %c0_98 = arith.constant 0 : index
    %c0_99 = arith.constant 0 : index
    %182 = vector.load %arg9[%c0_98, %c0_99] : memref<8x128xf32, #tpu.memory_space<vmem>>, vector<8x128xf32>
    tpu.vector_store %arg9[%c0_98, %c0_99], %180 {strides = array<i32>} : memref<8x128xf32, #tpu.memory_space<vmem>>, vector<8x128xf32>,
    %c4_i32 = arith.constant 4 : i32
    %c8_i32_100 = arith.constant 8 : i32
    %183 = arith.muli %c4_i32, %c8_i32_100 : i32
    %184 = tpu.assume_multiple %183, 8 : i32
    %185 = arith.index_cast %184 : i32 to index
    %c0_101 = arith.constant 0 : index
    %186 = vector.load %arg8[%185, %c0_101] : memref<64x512xf32, #tpu.memory_space<vmem>>, vector<8x512xf32>
    %c0_102 = arith.constant 0 : index
    %c0_103 = arith.constant 0 : index
    %187 = vector.load %arg9[%c0_102, %c0_103] : memref<8x128xf32, #tpu.memory_space<vmem>>, vector<8x128xf32>
    %188 = arith.truncf %187 : vector<8x128xf32> to vector<8x128xbf16>
    %c0_104 = arith.constant 0 : index
    %c0_105 = arith.constant 0 : index
    %189 = vector.load %arg3[%c0_104, %c0_105] : memref<128x512xbf16, #tpu.memory_space<vmem>>, vector<128x512xbf16>
    %cst_106 = arith.constant dense<0.000000e+00> : vector<8x512xf32>
    %190 = tpu.matmul %188, %189, %cst_106 {dimension_numbers = #tpu.dot_dimension_numbers<[1], [0], [0], [1], [0, 0, 1, 1], [], []>} : vector<8x128xbf16>, vector<128x512xbf16>, vector<8x512xf32> -> vector<8x512xf32>
    %191 = arith.addf %186, %190 : vector<8x512xf32>
    %192 = vector.extract_strided_slice %191 {offsets = [0, 0], sizes = [8, 128], strides = [1, 1]} : vector<8x512xf32> to vector<8x128xf32>
    %cst_107 = arith.constant 5.000000e-01 : f32
    %193 = vector.broadcast %cst_107 : f32 to vector<8x128xf32>
    %194 = arith.mulf %193, %192 : vector<8x128xf32>
    %195 = math.tanh %194 : vector<8x128xf32>
    %cst_108 = arith.constant 1.000000e+00 : f32
    %196 = vector.broadcast %cst_108 : f32 to vector<8x128xf32>
    %197 = arith.addf %195, %196 : vector<8x128xf32>
    %cst_109 = arith.constant 5.000000e-01 : f32
    %198 = vector.broadcast %cst_109 : f32 to vector<8x128xf32>
    %199 = arith.mulf %198, %197 : vector<8x128xf32>
    %200 = vector.extract_strided_slice %191 {offsets = [0, 128], sizes = [8, 128], strides = [1, 1]} : vector<8x512xf32> to vector<8x128xf32>
    %cst_110 = arith.constant 5.000000e-01 : f32
    %201 = vector.broadcast %cst_110 : f32 to vector<8x128xf32>
    %202 = arith.mulf %201, %200 : vector<8x128xf32>
    %203 = math.tanh %202 : vector<8x128xf32>
    %cst_111 = arith.constant 1.000000e+00 : f32
    %204 = vector.broadcast %cst_111 : f32 to vector<8x128xf32>
    %205 = arith.addf %203, %204 : vector<8x128xf32>
    %cst_112 = arith.constant 5.000000e-01 : f32
    %206 = vector.broadcast %cst_112 : f32 to vector<8x128xf32>
    %207 = arith.mulf %206, %205 : vector<8x128xf32>
    %208 = vector.extract_strided_slice %191 {offsets = [0, 256], sizes = [8, 128], strides = [1, 1]} : vector<8x512xf32> to vector<8x128xf32>
    %209 = math.tanh %208 : vector<8x128xf32>
    %210 = vector.extract_strided_slice %191 {offsets = [0, 384], sizes = [8, 128], strides = [1, 1]} : vector<8x512xf32> to vector<8x128xf32>
    %cst_113 = arith.constant 5.000000e-01 : f32
    %211 = vector.broadcast %cst_113 : f32 to vector<8x128xf32>
    %212 = arith.mulf %211, %210 : vector<8x128xf32>
    %213 = math.tanh %212 : vector<8x128xf32>
    %cst_114 = arith.constant 1.000000e+00 : f32
    %214 = vector.broadcast %cst_114 : f32 to vector<8x128xf32>
    %215 = arith.addf %213, %214 : vector<8x128xf32>
    %cst_115 = arith.constant 5.000000e-01 : f32
    %216 = vector.broadcast %cst_115 : f32 to vector<8x128xf32>
    %217 = arith.mulf %216, %215 : vector<8x128xf32>
    %c0_116 = arith.constant 0 : index
    %c0_117 = arith.constant 0 : index
    %218 = vector.load %arg10[%c0_116, %c0_117] : memref<8x128xf32, #tpu.memory_space<vmem>>, vector<8x128xf32>
    %219 = arith.mulf %207, %218 : vector<8x128xf32>
    %220 = arith.mulf %199, %209 : vector<8x128xf32>
    %221 = arith.addf %219, %220 : vector<8x128xf32>
    %222 = math.tanh %221 : vector<8x128xf32>
    %223 = arith.mulf %217, %222 : vector<8x128xf32>
    %c0_118 = arith.constant 0 : index
    %c0_119 = arith.constant 0 : index
    %224 = vector.load %arg10[%c0_118, %c0_119] : memref<8x128xf32, #tpu.memory_space<vmem>>, vector<8x128xf32>
    tpu.vector_store %arg10[%c0_118, %c0_119], %221 {strides = array<i32>} : memref<8x128xf32, #tpu.memory_space<vmem>>, vector<8x128xf32>,
    %c0_120 = arith.constant 0 : index
    %c0_121 = arith.constant 0 : index
    %225 = vector.load %arg9[%c0_120, %c0_121] : memref<8x128xf32, #tpu.memory_space<vmem>>, vector<8x128xf32>
    tpu.vector_store %arg9[%c0_120, %c0_121], %223 {strides = array<i32>} : memref<8x128xf32, #tpu.memory_space<vmem>>, vector<8x128xf32>,
    %c5_i32 = arith.constant 5 : i32
    %c8_i32_122 = arith.constant 8 : i32
    %226 = arith.muli %c5_i32, %c8_i32_122 : i32
    %227 = tpu.assume_multiple %226, 8 : i32
    %228 = arith.index_cast %227 : i32 to index
    %c0_123 = arith.constant 0 : index
    %229 = vector.load %arg8[%228, %c0_123] : memref<64x512xf32, #tpu.memory_space<vmem>>, vector<8x512xf32>
    %c0_124 = arith.constant 0 : index
    %c0_125 = arith.constant 0 : index
    %230 = vector.load %arg9[%c0_124, %c0_125] : memref<8x128xf32, #tpu.memory_space<vmem>>, vector<8x128xf32>
    %231 = arith.truncf %230 : vector<8x128xf32> to vector<8x128xbf16>
    %c0_126 = arith.constant 0 : index
    %c0_127 = arith.constant 0 : index
    %232 = vector.load %arg3[%c0_126, %c0_127] : memref<128x512xbf16, #tpu.memory_space<vmem>>, vector<128x512xbf16>
    %cst_128 = arith.constant dense<0.000000e+00> : vector<8x512xf32>
    %233 = tpu.matmul %231, %232, %cst_128 {dimension_numbers = #tpu.dot_dimension_numbers<[1], [0], [0], [1], [0, 0, 1, 1], [], []>} : vector<8x128xbf16>, vector<128x512xbf16>, vector<8x512xf32> -> vector<8x512xf32>
    %234 = arith.addf %229, %233 : vector<8x512xf32>
    %235 = vector.extract_strided_slice %234 {offsets = [0, 0], sizes = [8, 128], strides = [1, 1]} : vector<8x512xf32> to vector<8x128xf32>
    %cst_129 = arith.constant 5.000000e-01 : f32
    %236 = vector.broadcast %cst_129 : f32 to vector<8x128xf32>
    %237 = arith.mulf %236, %235 : vector<8x128xf32>
    %238 = math.tanh %237 : vector<8x128xf32>
    %cst_130 = arith.constant 1.000000e+00 : f32
    %239 = vector.broadcast %cst_130 : f32 to vector<8x128xf32>
    %240 = arith.addf %238, %239 : vector<8x128xf32>
    %cst_131 = arith.constant 5.000000e-01 : f32
    %241 = vector.broadcast %cst_131 : f32 to vector<8x128xf32>
    %242 = arith.mulf %241, %240 : vector<8x128xf32>
    %243 = vector.extract_strided_slice %234 {offsets = [0, 128], sizes = [8, 128], strides = [1, 1]} : vector<8x512xf32> to vector<8x128xf32>
    %cst_132 = arith.constant 5.000000e-01 : f32
    %244 = vector.broadcast %cst_132 : f32 to vector<8x128xf32>
    %245 = arith.mulf %244, %243 : vector<8x128xf32>
    %246 = math.tanh %245 : vector<8x128xf32>
    %cst_133 = arith.constant 1.000000e+00 : f32
    %247 = vector.broadcast %cst_133 : f32 to vector<8x128xf32>
    %248 = arith.addf %246, %247 : vector<8x128xf32>
    %cst_134 = arith.constant 5.000000e-01 : f32
    %249 = vector.broadcast %cst_134 : f32 to vector<8x128xf32>
    %250 = arith.mulf %249, %248 : vector<8x128xf32>
    %251 = vector.extract_strided_slice %234 {offsets = [0, 256], sizes = [8, 128], strides = [1, 1]} : vector<8x512xf32> to vector<8x128xf32>
    %252 = math.tanh %251 : vector<8x128xf32>
    %253 = vector.extract_strided_slice %234 {offsets = [0, 384], sizes = [8, 128], strides = [1, 1]} : vector<8x512xf32> to vector<8x128xf32>
    %cst_135 = arith.constant 5.000000e-01 : f32
    %254 = vector.broadcast %cst_135 : f32 to vector<8x128xf32>
    %255 = arith.mulf %254, %253 : vector<8x128xf32>
    %256 = math.tanh %255 : vector<8x128xf32>
    %cst_136 = arith.constant 1.000000e+00 : f32
    %257 = vector.broadcast %cst_136 : f32 to vector<8x128xf32>
    %258 = arith.addf %256, %257 : vector<8x128xf32>
    %cst_137 = arith.constant 5.000000e-01 : f32
    %259 = vector.broadcast %cst_137 : f32 to vector<8x128xf32>
    %260 = arith.mulf %259, %258 : vector<8x128xf32>
    %c0_138 = arith.constant 0 : index
    %c0_139 = arith.constant 0 : index
    %261 = vector.load %arg10[%c0_138, %c0_139] : memref<8x128xf32, #tpu.memory_space<vmem>>, vector<8x128xf32>
    %262 = arith.mulf %250, %261 : vector<8x128xf32>
    %263 = arith.mulf %242, %252 : vector<8x128xf32>
    %264 = arith.addf %262, %263 : vector<8x128xf32>
    %265 = math.tanh %264 : vector<8x128xf32>
    %266 = arith.mulf %260, %265 : vector<8x128xf32>
    %c0_140 = arith.constant 0 : index
    %c0_141 = arith.constant 0 : index
    %267 = vector.load %arg10[%c0_140, %c0_141] : memref<8x128xf32, #tpu.memory_space<vmem>>, vector<8x128xf32>
    tpu.vector_store %arg10[%c0_140, %c0_141], %264 {strides = array<i32>} : memref<8x128xf32, #tpu.memory_space<vmem>>, vector<8x128xf32>,
    %c0_142 = arith.constant 0 : index
    %c0_143 = arith.constant 0 : index
    %268 = vector.load %arg9[%c0_142, %c0_143] : memref<8x128xf32, #tpu.memory_space<vmem>>, vector<8x128xf32>
    tpu.vector_store %arg9[%c0_142, %c0_143], %266 {strides = array<i32>} : memref<8x128xf32, #tpu.memory_space<vmem>>, vector<8x128xf32>,
    %c6_i32 = arith.constant 6 : i32
    %c8_i32_144 = arith.constant 8 : i32
    %269 = arith.muli %c6_i32, %c8_i32_144 : i32
    %270 = tpu.assume_multiple %269, 8 : i32
    %271 = arith.index_cast %270 : i32 to index
    %c0_145 = arith.constant 0 : index
    %272 = vector.load %arg8[%271, %c0_145] : memref<64x512xf32, #tpu.memory_space<vmem>>, vector<8x512xf32>
    %c0_146 = arith.constant 0 : index
    %c0_147 = arith.constant 0 : index
    %273 = vector.load %arg9[%c0_146, %c0_147] : memref<8x128xf32, #tpu.memory_space<vmem>>, vector<8x128xf32>
    %274 = arith.truncf %273 : vector<8x128xf32> to vector<8x128xbf16>
    %c0_148 = arith.constant 0 : index
    %c0_149 = arith.constant 0 : index
    %275 = vector.load %arg3[%c0_148, %c0_149] : memref<128x512xbf16, #tpu.memory_space<vmem>>, vector<128x512xbf16>
    %cst_150 = arith.constant dense<0.000000e+00> : vector<8x512xf32>
    %276 = tpu.matmul %274, %275, %cst_150 {dimension_numbers = #tpu.dot_dimension_numbers<[1], [0], [0], [1], [0, 0, 1, 1], [], []>} : vector<8x128xbf16>, vector<128x512xbf16>, vector<8x512xf32> -> vector<8x512xf32>
    %277 = arith.addf %272, %276 : vector<8x512xf32>
    %278 = vector.extract_strided_slice %277 {offsets = [0, 0], sizes = [8, 128], strides = [1, 1]} : vector<8x512xf32> to vector<8x128xf32>
    %cst_151 = arith.constant 5.000000e-01 : f32
    %279 = vector.broadcast %cst_151 : f32 to vector<8x128xf32>
    %280 = arith.mulf %279, %278 : vector<8x128xf32>
    %281 = math.tanh %280 : vector<8x128xf32>
    %cst_152 = arith.constant 1.000000e+00 : f32
    %282 = vector.broadcast %cst_152 : f32 to vector<8x128xf32>
    %283 = arith.addf %281, %282 : vector<8x128xf32>
    %cst_153 = arith.constant 5.000000e-01 : f32
    %284 = vector.broadcast %cst_153 : f32 to vector<8x128xf32>
    %285 = arith.mulf %284, %283 : vector<8x128xf32>
    %286 = vector.extract_strided_slice %277 {offsets = [0, 128], sizes = [8, 128], strides = [1, 1]} : vector<8x512xf32> to vector<8x128xf32>
    %cst_154 = arith.constant 5.000000e-01 : f32
    %287 = vector.broadcast %cst_154 : f32 to vector<8x128xf32>
    %288 = arith.mulf %287, %286 : vector<8x128xf32>
    %289 = math.tanh %288 : vector<8x128xf32>
    %cst_155 = arith.constant 1.000000e+00 : f32
    %290 = vector.broadcast %cst_155 : f32 to vector<8x128xf32>
    %291 = arith.addf %289, %290 : vector<8x128xf32>
    %cst_156 = arith.constant 5.000000e-01 : f32
    %292 = vector.broadcast %cst_156 : f32 to vector<8x128xf32>
    %293 = arith.mulf %292, %291 : vector<8x128xf32>
    %294 = vector.extract_strided_slice %277 {offsets = [0, 256], sizes = [8, 128], strides = [1, 1]} : vector<8x512xf32> to vector<8x128xf32>
    %295 = math.tanh %294 : vector<8x128xf32>
    %296 = vector.extract_strided_slice %277 {offsets = [0, 384], sizes = [8, 128], strides = [1, 1]} : vector<8x512xf32> to vector<8x128xf32>
    %cst_157 = arith.constant 5.000000e-01 : f32
    %297 = vector.broadcast %cst_157 : f32 to vector<8x128xf32>
    %298 = arith.mulf %297, %296 : vector<8x128xf32>
    %299 = math.tanh %298 : vector<8x128xf32>
    %cst_158 = arith.constant 1.000000e+00 : f32
    %300 = vector.broadcast %cst_158 : f32 to vector<8x128xf32>
    %301 = arith.addf %299, %300 : vector<8x128xf32>
    %cst_159 = arith.constant 5.000000e-01 : f32
    %302 = vector.broadcast %cst_159 : f32 to vector<8x128xf32>
    %303 = arith.mulf %302, %301 : vector<8x128xf32>
    %c0_160 = arith.constant 0 : index
    %c0_161 = arith.constant 0 : index
    %304 = vector.load %arg10[%c0_160, %c0_161] : memref<8x128xf32, #tpu.memory_space<vmem>>, vector<8x128xf32>
    %305 = arith.mulf %293, %304 : vector<8x128xf32>
    %306 = arith.mulf %285, %295 : vector<8x128xf32>
    %307 = arith.addf %305, %306 : vector<8x128xf32>
    %308 = math.tanh %307 : vector<8x128xf32>
    %309 = arith.mulf %303, %308 : vector<8x128xf32>
    %c0_162 = arith.constant 0 : index
    %c0_163 = arith.constant 0 : index
    %310 = vector.load %arg10[%c0_162, %c0_163] : memref<8x128xf32, #tpu.memory_space<vmem>>, vector<8x128xf32>
    tpu.vector_store %arg10[%c0_162, %c0_163], %307 {strides = array<i32>} : memref<8x128xf32, #tpu.memory_space<vmem>>, vector<8x128xf32>,
    %c0_164 = arith.constant 0 : index
    %c0_165 = arith.constant 0 : index
    %311 = vector.load %arg9[%c0_164, %c0_165] : memref<8x128xf32, #tpu.memory_space<vmem>>, vector<8x128xf32>
    tpu.vector_store %arg9[%c0_164, %c0_165], %309 {strides = array<i32>} : memref<8x128xf32, #tpu.memory_space<vmem>>, vector<8x128xf32>,
    %c7_i32 = arith.constant 7 : i32
    %c8_i32_166 = arith.constant 8 : i32
    %312 = arith.muli %c7_i32, %c8_i32_166 : i32
    %313 = tpu.assume_multiple %312, 8 : i32
    %314 = arith.index_cast %313 : i32 to index
    %c0_167 = arith.constant 0 : index
    %315 = vector.load %arg8[%314, %c0_167] : memref<64x512xf32, #tpu.memory_space<vmem>>, vector<8x512xf32>
    %c0_168 = arith.constant 0 : index
    %c0_169 = arith.constant 0 : index
    %316 = vector.load %arg9[%c0_168, %c0_169] : memref<8x128xf32, #tpu.memory_space<vmem>>, vector<8x128xf32>
    %317 = arith.truncf %316 : vector<8x128xf32> to vector<8x128xbf16>
    %c0_170 = arith.constant 0 : index
    %c0_171 = arith.constant 0 : index
    %318 = vector.load %arg3[%c0_170, %c0_171] : memref<128x512xbf16, #tpu.memory_space<vmem>>, vector<128x512xbf16>
    %cst_172 = arith.constant dense<0.000000e+00> : vector<8x512xf32>
    %319 = tpu.matmul %317, %318, %cst_172 {dimension_numbers = #tpu.dot_dimension_numbers<[1], [0], [0], [1], [0, 0, 1, 1], [], []>} : vector<8x128xbf16>, vector<128x512xbf16>, vector<8x512xf32> -> vector<8x512xf32>
    %320 = arith.addf %315, %319 : vector<8x512xf32>
    %321 = vector.extract_strided_slice %320 {offsets = [0, 0], sizes = [8, 128], strides = [1, 1]} : vector<8x512xf32> to vector<8x128xf32>
    %cst_173 = arith.constant 5.000000e-01 : f32
    %322 = vector.broadcast %cst_173 : f32 to vector<8x128xf32>
    %323 = arith.mulf %322, %321 : vector<8x128xf32>
    %324 = math.tanh %323 : vector<8x128xf32>
    %cst_174 = arith.constant 1.000000e+00 : f32
    %325 = vector.broadcast %cst_174 : f32 to vector<8x128xf32>
    %326 = arith.addf %324, %325 : vector<8x128xf32>
    %cst_175 = arith.constant 5.000000e-01 : f32
    %327 = vector.broadcast %cst_175 : f32 to vector<8x128xf32>
    %328 = arith.mulf %327, %326 : vector<8x128xf32>
    %329 = vector.extract_strided_slice %320 {offsets = [0, 128], sizes = [8, 128], strides = [1, 1]} : vector<8x512xf32> to vector<8x128xf32>
    %cst_176 = arith.constant 5.000000e-01 : f32
    %330 = vector.broadcast %cst_176 : f32 to vector<8x128xf32>
    %331 = arith.mulf %330, %329 : vector<8x128xf32>
    %332 = math.tanh %331 : vector<8x128xf32>
    %cst_177 = arith.constant 1.000000e+00 : f32
    %333 = vector.broadcast %cst_177 : f32 to vector<8x128xf32>
    %334 = arith.addf %332, %333 : vector<8x128xf32>
    %cst_178 = arith.constant 5.000000e-01 : f32
    %335 = vector.broadcast %cst_178 : f32 to vector<8x128xf32>
    %336 = arith.mulf %335, %334 : vector<8x128xf32>
    %337 = vector.extract_strided_slice %320 {offsets = [0, 256], sizes = [8, 128], strides = [1, 1]} : vector<8x512xf32> to vector<8x128xf32>
    %338 = math.tanh %337 : vector<8x128xf32>
    %339 = vector.extract_strided_slice %320 {offsets = [0, 384], sizes = [8, 128], strides = [1, 1]} : vector<8x512xf32> to vector<8x128xf32>
    %cst_179 = arith.constant 5.000000e-01 : f32
    %340 = vector.broadcast %cst_179 : f32 to vector<8x128xf32>
    %341 = arith.mulf %340, %339 : vector<8x128xf32>
    %342 = math.tanh %341 : vector<8x128xf32>
    %cst_180 = arith.constant 1.000000e+00 : f32
    %343 = vector.broadcast %cst_180 : f32 to vector<8x128xf32>
    %344 = arith.addf %342, %343 : vector<8x128xf32>
    %cst_181 = arith.constant 5.000000e-01 : f32
    %345 = vector.broadcast %cst_181 : f32 to vector<8x128xf32>
    %346 = arith.mulf %345, %344 : vector<8x128xf32>
    %c0_182 = arith.constant 0 : index
    %c0_183 = arith.constant 0 : index
    %347 = vector.load %arg10[%c0_182, %c0_183] : memref<8x128xf32, #tpu.memory_space<vmem>>, vector<8x128xf32>
    %348 = arith.mulf %336, %347 : vector<8x128xf32>
    %349 = arith.mulf %328, %338 : vector<8x128xf32>
    %350 = arith.addf %348, %349 : vector<8x128xf32>
    %351 = math.tanh %350 : vector<8x128xf32>
    %352 = arith.mulf %346, %351 : vector<8x128xf32>
    %c0_184 = arith.constant 0 : index
    %c0_185 = arith.constant 0 : index
    %353 = vector.load %arg10[%c0_184, %c0_185] : memref<8x128xf32, #tpu.memory_space<vmem>>, vector<8x128xf32>
    tpu.vector_store %arg10[%c0_184, %c0_185], %350 {strides = array<i32>} : memref<8x128xf32, #tpu.memory_space<vmem>>, vector<8x128xf32>,
    %c0_186 = arith.constant 0 : index
    %c0_187 = arith.constant 0 : index
    %354 = vector.load %arg9[%c0_186, %c0_187] : memref<8x128xf32, #tpu.memory_space<vmem>>, vector<8x128xf32>
    tpu.vector_store %arg9[%c0_186, %c0_187], %352 {strides = array<i32>} : memref<8x128xf32, #tpu.memory_space<vmem>>, vector<8x128xf32>,
    %c8_i32_188 = arith.constant 8 : i32
    %c0_189 = arith.constant 0 : index
    %c0_190 = arith.constant 0 : index
    %355 = vector.load %arg9[%c0_189, %c0_190] : memref<8x128xf32, #tpu.memory_space<vmem>>, vector<8x128xf32>
    %356 = arith.truncf %355 : vector<8x128xf32> to vector<8x128xbf16>
    %c0_191 = arith.constant 0 : index
    %c0_192 = arith.constant 0 : index
    %357 = vector.load %arg5[%c0_191, %c0_192] : memref<128x128xbf16, #tpu.memory_space<vmem>>, vector<128x128xbf16>
    %cst_193 = arith.constant dense<0.000000e+00> : vector<8x128xf32>
    %358 = tpu.matmul %356, %357, %cst_193 {dimension_numbers = #tpu.dot_dimension_numbers<[1], [0], [0], [1], [0, 0, 1, 1], [], []>} : vector<8x128xbf16>, vector<128x128xbf16>, vector<8x128xf32> -> vector<8x128xf32>
    %c0_194 = arith.constant 0 : index
    %c0_195 = arith.constant 0 : index
    %359 = vector.load %arg6[%c0_194, %c0_195] : memref<1x128xf32, #tpu.memory_space<vmem>>, vector<1x128xf32>
    %360 = vector.broadcast %359 : vector<1x128xf32> to vector<8x128xf32>
    %361 = arith.addf %358, %360 : vector<8x128xf32>
    %c0_196 = arith.constant 0 : index
    %c0_197 = arith.constant 0 : index
    %362 = vector.load %arg7[%c0_196, %c0_197] : memref<8x128xf32, #tpu.memory_space<vmem>>, vector<8x128xf32>
    tpu.vector_store %arg7[%c0_196, %c0_197], %361 {strides = array<i32>} : memref<8x128xf32, #tpu.memory_space<vmem>>, vector<8x128xf32>,
    return
  }
  func.func @transform_0(%arg0: i32) -> (i32, i32) {
    %c0_i32 = arith.constant 0 : i32
    %c0_i32_0 = arith.constant 0 : i32
    %c0_i32_1 = arith.constant 0 : i32
    return %c0_i32, %c0_i32_0 : i32, i32
  }
  func.func @transform_1(%arg0: i32) -> (i32, i32) {
    %c0_i32 = arith.constant 0 : i32
    %c0_i32_0 = arith.constant 0 : i32
    %c0_i32_1 = arith.constant 0 : i32
    return %c0_i32, %c0_i32_0 : i32, i32
  }
  func.func @transform_2(%arg0: i32) -> (i32, i32) {
    %c0_i32 = arith.constant 0 : i32
    %c0_i32_0 = arith.constant 0 : i32
    %c0_i32_1 = arith.constant 0 : i32
    return %c0_i32, %c0_i32_0 : i32, i32
  }
  func.func @transform_3(%arg0: i32) -> (i32, i32) {
    %c0_i32 = arith.constant 0 : i32
    %c0_i32_0 = arith.constant 0 : i32
    %c0_i32_1 = arith.constant 0 : i32
    return %c0_i32, %c0_i32_0 : i32, i32
  }
  func.func @transform_4(%arg0: i32) -> (i32, i32) {
    %c0_i32 = arith.constant 0 : i32
    %c0_i32_0 = arith.constant 0 : i32
    %c0_i32_1 = arith.constant 0 : i32
    return %c0_i32, %c0_i32_0 : i32, i32
  }
  func.func @transform_5(%arg0: i32) -> (i32, i32) {
    %c0_i32 = arith.constant 0 : i32
    %c0_i32_0 = arith.constant 0 : i32
    %c0_i32_1 = arith.constant 0 : i32
    return %c0_i32, %c0_i32_0 : i32, i32
  }
  func.func @transform_6(%arg0: i32) -> (i32, i32) {
    %c0_i32 = arith.constant 0 : i32
    %c0_i32_0 = arith.constant 0 : i32
    %c0_i32_1 = arith.constant 0 : i32
    return %c0_i32, %c0_i32_0 : i32, i32
  }
}

</mosaic_0001>

<bundles_post_ra>
// kernel: tpu_custom_call.1
= control target key start
LH: loop header
LB: loop body
LE: loop exit
PB: predicated region body
PF: predicated region fallthrough
CT: control target
= control target key end

     0   :  { %11 = vsyncpa [#allocation7], 0  ;;  %s4422_s0 = inlined_call_operand.hbm [shape: bf16[64,128], index: 0, kind: input, shape index: {}]   ;;  %s4423_s1 = inlined_call_operand.hbm [shape: bf16[128,512], index: 1, kind: input, shape index: {}]   ;;  %s4424_s2 = inlined_call_operand.hbm [shape: bf16[128,512], index: 2, kind: input, shape index: {}]   ;;  %s4425_s3 = inlined_call_operand.vmem [shape: f32[1,512], index: 3, kind: input, shape index: {}]   ;;  %s4426_s4 = inlined_call_operand.hbm [shape: bf16[128,128], index: 4, kind: input, shape index: {}]   ;;  %s4427_s5 = inlined_call_operand.vmem [shape: f32[1,128], index: 5, kind: input, shape index: {}]   ;;  %s4428_s6 = inlined_call_operand.hbm [shape: f32[8,128], index: 6, kind: output, shape index: {}]  }
   0x1   :  { %12 = vsyncpa [#allocation10], 0 }
   0x2   :  { %13 = vsyncpa [#allocation13], 0 }
   0x3   :  { %14 = vsyncpa [#allocation8], 0  ;;  %s3795_s21 = smov [#allocation9]  }
   0x4   :  { %s32_s22 = sshll.u32 %s3795_s21, 4  ;;  %s33_s22 = int_to_ptr.vmem [resolvable:$true] %s32_s22 }
   0x5   :  { %s3695_s23 = scalar_lea.vmem %s33_s22, 4096  ;;  %p3700_p1 = scmp.lt.s32.totalorder %s33_s22, %s33_s22 }
   0x6   :  { %p3696_p0 = scmp.ne.s32.totalorder %s33_s22, %s3695_s23  ;;  %p3701_p2 = scmp.lt.s32.totalorder %s3695_s23, %s3695_s23 }
   0x8   :  { %p3702_p3 = por %p3701_p2, %p3700_p1 }
   0xa   :  { %p3703_p4 = pnand %p3702_p3, %p3696_p0 }
   0xc   :  { %3706 = shalt.err (!%p3703_p4)
}
   0xd   :  { %s3796_s24 = smov 256   ;;  %s3797_s25 = smov 16  }
   0xe   :  { %38 = dma.hbm_to_vmem [thread:$0]  %s4423_s1, 4096, %s33_s22, [#allocation10], %s3796_s24, %s3796_s24, %s3797_s25  }
   0xf   :  { %s3798_s28 = smov [#allocation6]  }
  0x10   :  { %s20_s29 = sshll.u32 %s3798_s28, 4  ;;  %s21_s29 = int_to_ptr.vmem [resolvable:$true] %s20_s29 }
  0x11   :  { %s3715_s30 = scalar_lea.vmem %s21_s29, 512  ;;  %p3720_p6 = scmp.lt.s32.totalorder %s21_s29, %s21_s29 }
  0x12   :  { %p3716_p5 = scmp.ne.s32.totalorder %s21_s29, %s3715_s30  ;;  %p3721_p7 = scmp.lt.s32.totalorder %s3715_s30, %s3715_s30 }
  0x14   :  { %p3722_p8 = por %p3721_p7, %p3720_p6 }
  0x16   :  { %p3723_p9 = pnand %p3722_p8, %p3716_p5 }
  0x18   :  { %3726 = shalt.err (!%p3723_p9)
}
  0x19   :  { %s3799_s7 = smov 64   ;;  %s3800_s8 = smov 4  }
  0x1a   :  { %26 = dma.hbm_to_vmem [thread:$0]  %s4422_s0, 512, %s21_s29, [#allocation7], %s3799_s7, %s3799_s7, %s3800_s8  }
  0x1b   :  { %s3801_s11 = smov [#allocation11]   ;;  %s3802_s13 = smov [#allocation12]  }
  0x1c   :  { %s44_s12 = sshll.u32 %s3801_s11, 4  ;;  %s58_s1 = sshll.u32 %s3802_s13, 4  ;;  %s45_s12 = int_to_ptr.vmem [resolvable:$true] %s44_s12  ;;  %s59_s1 = int_to_ptr.vmem [resolvable:$true] %s58_s1 }
  0x1d   :  { %s3735_s14 = scalar_lea.vmem %s45_s12, 4096  ;;  %p3740_p11 = scmp.lt.s32.totalorder %s45_s12, %s45_s12 }
  0x1e   :  { %p3736_p10 = scmp.ne.s32.totalorder %s45_s12, %s3735_s14  ;;  %p3741_p12 = scmp.lt.s32.totalorder %s3735_s14, %s3735_s14 }
  0x20   :  { %p3742_p13 = por %p3741_p12, %p3740_p11 }
  0x22   :  { %p3743_p0 = pnand %p3742_p13, %p3736_p10 }
  0x24   :  { %3746 = shalt.err (!%p3743_p0)
}
  0x25   :  { %50 = dma.hbm_to_vmem [thread:$0]  %s4424_s2, 4096, %s45_s12, [#allocation10], %s3796_s24, %s3796_s24, %s3797_s25  }
  0x26   :  { %s3755_s0 = scalar_lea.vmem %s59_s1, 1024  ;;  %p3760_p2 = scmp.lt.s32.totalorder %s59_s1, %s59_s1 }
  0x27   :  { %p3756_p1 = scmp.ne.s32.totalorder %s59_s1, %s3755_s0  ;;  %p3761_p3 = scmp.lt.s32.totalorder %s3755_s0, %s3755_s0 }
  0x29   :  { %p3762_p4 = por %p3761_p3, %p3760_p2 }
  0x2b   :  { %p3763_p5 = pnand %p3762_p4, %p3756_p1 }
  0x2d   :  { %3766 = shalt.err (!%p3763_p5)
}
  0x2e   :  { %64 = dma.hbm_to_vmem [thread:$0]  %s4426_s4, 1024, %s59_s1, [#allocation13], %s3799_s7, %s3799_s7, %s3800_s8  }
  0x2f   :  { %3787 = dma.done.wait [#allocation7], 512  }
  0x30   :  { %3788 = vsyncadd [#allocation7], 4294966784 }
  0x31   :  { %3789 = dma.done.wait [#allocation10], 8192  }
  0x32   :  { %3790 = vsyncadd [#allocation10], 4294959104 }
  0x33   :  { %3791 = dma.done.wait [#allocation13], 1024  }
  0x34   :  { %3792 = vsyncadd [#allocation13], 4294966272  ;;  %v4429_v0 = vmov 0   ;;  %v3451_v1 = vld [vmem:[#allocation9 + $0xe4] ss:$16 sps:$4 sm:$0xff]   ;;  %v3512_v44 = vld [vmem:[#allocation6 + $0x8] sm:$0xff]  }
  0x35   :  { %358 = vmatprep.mubr.bf16.mxu0 %v4429_v0  ;;  %431 = vmatprep.mubr.bf16.mxu1 %v4429_v0  ;;  %v3453_v2 = vld [vmem:[#allocation9 + $0xec] ss:$16 sps:$4 sm:$0xff]   ;;  %v3455_v3 = vld [vmem:[#allocation9 + $0xe0] ss:$16 sps:$4 sm:$0xff]   ;;  %v3456_v4 = vld [vmem:[#allocation9 + $0xe8] ss:$16 sps:$4 sm:$0xff]  }
  0x36   :  { %326 = vmatprep.subr.bf16.mxu0 %v3451_v1  ;;  %399 = vmatprep.subr.bf16.mxu1 %v3453_v2  ;;  %v3457_v5 = vld [vmem:[#allocation9 + $0xc4] ss:$16 sps:$4 sm:$0xff]   ;;  %v3459_v6 = vld [vmem:[#allocation9 + $0xcc] ss:$16 sps:$4 sm:$0xff]   ;;  %v3461_v7 = vld [vmem:[#allocation9 + $0xc0] ss:$16 sps:$4 sm:$0xff]  }
  0x37   :  { %327 = vmatpush1.bf16.msra.mxu0 %v3455_v3  ;;  %400 = vmatpush1.bf16.msra.mxu1 %v3456_v4  ;;  %v3462_v8 = vld [vmem:[#allocation9 + $0xc8] ss:$16 sps:$4 sm:$0xff]   ;;  %v3463_v9 = vld [vmem:[#allocation9 + $0xa4] ss:$16 sps:$4 sm:$0xff]   ;;  %v3465_v10 = vld [vmem:[#allocation9 + $0xac] ss:$16 sps:$4 sm:$0xff]  }
  0x38   :  { %328 = vmatprep.subr.bf16.mxu0 %v3457_v5  ;;  %401 = vmatprep.subr.bf16.mxu1 %v3459_v6  ;;  %v3467_v11 = vld [vmem:[#allocation9 + $0xa0] ss:$16 sps:$4 sm:$0xff]   ;;  %v3468_v12 = vld [vmem:[#allocation9 + $0xa8] ss:$16 sps:$4 sm:$0xff]   ;;  %v3469_v13 = vld [vmem:[#allocation9 + $0x84] ss:$16 sps:$4 sm:$0xff]  }
  0x39   :  { %v3471_v14 = vld [vmem:[#allocation9 + $0x8c] ss:$16 sps:$4 sm:$0xff]   ;;  %v3473_v15 = vld [vmem:[#allocation9 + $0x80] ss:$16 sps:$4 sm:$0xff]   ;;  %v3474_v16 = vld [vmem:[#allocation9 + $0x88] ss:$16 sps:$4 sm:$0xff]  }
  0x3a   :  { %v3475_v17 = vld [vmem:[#allocation9 + $0x64] ss:$16 sps:$4 sm:$0xff]   ;;  %v3477_v18 = vld [vmem:[#allocation9 + $0x6c] ss:$16 sps:$4 sm:$0xff]   ;;  %v3479_v19 = vld [vmem:[#allocation9 + $0x60] ss:$16 sps:$4 sm:$0xff]  }
  0x3b   :  { %329 = vmatpush1.bf16.msra.mxu0 %v3461_v7  ;;  %402 = vmatpush1.bf16.msra.mxu1 %v3462_v8  ;;  %v3480_v20 = vld [vmem:[#allocation9 + $0x68] ss:$16 sps:$4 sm:$0xff]   ;;  %v3481_v21 = vld [vmem:[#allocation9 + $0x44] ss:$16 sps:$4 sm:$0xff]   ;;  %v3483_v22 = vld [vmem:[#allocation9 + $0x4c] ss:$16 sps:$4 sm:$0xff]   ;;  %v122_v7 = vlaneseq }
  0x3c   :  { %330 = vmatprep.subr.bf16.mxu0 %v3463_v9  ;;  %403 = vmatprep.subr.bf16.mxu1 %v3465_v10  ;;  %v3485_v23 = vld [vmem:[#allocation9 + $0x40] ss:$16 sps:$4 sm:$0xff]   ;;  %v3486_v24 = vld [vmem:[#allocation9 + $0x48] ss:$16 sps:$4 sm:$0xff]   ;;  %v3487_v25 = vld [vmem:[#allocation9 + $0x24] ss:$16 sps:$4 sm:$0xff]  }
  0x3d   :  { %v3489_v26 = vld [vmem:[#allocation9 + $0x2c] ss:$16 sps:$4 sm:$0xff]   ;;  %v3491_v27 = vld [vmem:[#allocation9 + $0x20] ss:$16 sps:$4 sm:$0xff]   ;;  %v3492_v28 = vld [vmem:[#allocation9 + $0x28] ss:$16 sps:$4 sm:$0xff]  }
  0x3e   :  { %v3493_v29 = vld [vmem:[#allocation9 + $0x4] ss:$16 sps:$4 sm:$0xff]   ;;  %v3495_v30 = vld [vmem:[#allocation9 + $0xc] ss:$16 sps:$4 sm:$0xff]   ;;  %v3497_v31 = vld [vmem:[#allocation9] ss:$16 sps:$4 sm:$0xff]  }
  0x3f   :  { %331 = vmatpush1.bf16.msra.mxu0 %v3467_v11  ;;  %404 = vmatpush1.bf16.msra.mxu1 %v3468_v12  ;;  %v3498_v32 = vld [vmem:[#allocation9 + $0x8] ss:$16 sps:$4 sm:$0xff]   ;;  %v3863_v33 = vld [vmem:[#allocation11 + $0xe4] ss:$16 sps:$4 sm:$0xff]   ;;  %v3865_v34 = vld [vmem:[#allocation11 + $0xec] ss:$16 sps:$4 sm:$0xff]  }
  0x40   :  { %332 = vmatprep.subr.bf16.mxu0 %v3469_v13  ;;  %405 = vmatprep.subr.bf16.mxu1 %v3471_v14  ;;  %v3499_v35 = vld [vmem:[#allocation6] sm:$0xff]   ;;  %v3869_v37 = vld [vmem:[#allocation11 + $0xe8] ss:$16 sps:$4 sm:$0xff]   ;;  %v3875_v39 = vld [vmem:[#allocation11 + $0xcc] ss:$16 sps:$4 sm:$0xff]   ;;  %v3804_v6 = vmov 0.0|0.0  }
  0x41   :  { %v3867_v36 = vld [vmem:[#allocation11 + $0xe0] ss:$16 sps:$4 sm:$0xff]   ;;  %v3873_v38 = vld [vmem:[#allocation11 + $0xc4] ss:$16 sps:$4 sm:$0xff]   ;;  %v3881_v41 = vld [vmem:[#allocation11 + $0xc8] ss:$16 sps:$4 sm:$0xff]  }
  0x42   :  { %v3877_v40 = vld [vmem:[#allocation11 + $0xc0] ss:$16 sps:$4 sm:$0xff]   ;;  %v3885_v42 = vld [vmem:[#allocation11 + $0xa4] ss:$16 sps:$4 sm:$0xff]   ;;  %v3887_v43 = vld [vmem:[#allocation11 + $0xac] ss:$16 sps:$4 sm:$0xff]  }
  0x43   :  { %333 = vmatpush1.bf16.msra.mxu0 %v3473_v15  ;;  %406 = vmatpush1.bf16.msra.mxu1 %v3474_v16  ;;  %v3891_v45 = vld [vmem:[#allocation11 + $0xa0] ss:$16 sps:$4 sm:$0xff]   ;;  %v3893_v46 = vld [vmem:[#allocation11 + $0xa8] ss:$16 sps:$4 sm:$0xff]   ;;  %v3897_v47 = vld [vmem:[#allocation11 + $0x84] ss:$16 sps:$4 sm:$0xff]  }
  0x44   :  { %334 = vmatprep.subr.bf16.mxu0 %v3475_v17  ;;  %407 = vmatprep.subr.bf16.mxu1 %v3477_v18  ;;  %v3901_v48 = vld [vmem:[#allocation11 + $0x8c] ss:$16 sps:$4 sm:$0xff]   ;;  %v3903_v49 = vld [vmem:[#allocation11 + $0x80] ss:$16 sps:$4 sm:$0xff]   ;;  %v3905_v50 = vld [vmem:[#allocation11 + $0x88] ss:$16 sps:$4 sm:$0xff]  }
  0x45   :  { %v3909_v51 = vld [vmem:[#allocation11 + $0x64] ss:$16 sps:$4 sm:$0xff]   ;;  %v3913_v52 = vld [vmem:[#allocation11 + $0x6c] ss:$16 sps:$4 sm:$0xff]   ;;  %v3917_v54 = vld [vmem:[#allocation11 + $0x60] ss:$16 sps:$4 sm:$0xff]  }
  0x46   :  { %v3525_v53 = vld [vmem:[#allocation6 + $0x10] sm:$0xff]   ;;  %v3919_v55 = vld [vmem:[#allocation11 + $0x68] ss:$16 sps:$4 sm:$0xff]   ;;  %v3923_v57 = vld [vmem:[#allocation11 + $0x4c] ss:$16 sps:$4 sm:$0xff]   ;;  %v123_v8 = vshrl.u32 %v122_v7, 7 }
  0x47   :  { %335 = vmatpush1.bf16.msra.mxu0 %v3479_v19  ;;  %408 = vmatpush1.bf16.msra.mxu1 %v3480_v20  ;;  %v3921_v56 = vld [vmem:[#allocation11 + $0x44] ss:$16 sps:$4 sm:$0xff]   ;;  %v3929_v58 = vld [vmem:[#allocation11 + $0x40] ss:$16 sps:$4 sm:$0xff]   ;;  %v3931_v59 = vld [vmem:[#allocation11 + $0x48] ss:$16 sps:$4 sm:$0xff]  }
  0x48   :  { %336 = vmatprep.subr.bf16.mxu0 %v3481_v21  ;;  %409 = vmatprep.subr.bf16.mxu1 %v3483_v22  ;;  %v3933_v60 = vld [vmem:[#allocation11 + $0x24] ss:$16 sps:$4 sm:$0xff]   ;;  %v3935_v61 = vld [vmem:[#allocation11 + $0x2c] ss:$16 sps:$4 sm:$0xff]   ;;  %v3943_v63 = vld [vmem:[#allocation11 + $0x20] ss:$16 sps:$4 sm:$0xff]  }
  0x49   :  { %v3538_v62 = vld [vmem:[#allocation6 + $0x18] sm:$0xff]   ;;  %v3947_v2 = vld [vmem:[#allocation11 + $0x4] ss:$16 sps:$4 sm:$0xff]   ;;  %v3955_v4 = vld [vmem:[#allocation11] ss:$16 sps:$4 sm:$0xff]   ;;  %v132_v9 = vsub.s32 2, %v123_v8 }
  0x4a   :  { %v3945_v1 = vld [vmem:[#allocation11 + $0x28] ss:$16 sps:$4 sm:$0xff]   ;;  %v3949_v3 = vld [vmem:[#allocation11 + $0xc] ss:$16 sps:$4 sm:$0xff]   ;;  %v124_v10 = vsub.s32 0, %v123_v8  ;;  %v136_v11 = vsub.s32 3, %v123_v8 }
  0x4b   :  { %337 = vmatpush1.bf16.msra.mxu0 %v3485_v23  ;;  %410 = vmatpush1.bf16.msra.mxu1 %v3486_v24  ;;  %v3957_v5 = vld [vmem:[#allocation11 + $0x8] ss:$16 sps:$4 sm:$0xff]   ;;  %v120_v12 = vld [vmem:[%s4425_s3] sm:$0xf]  ;;  %v128_v16 = vsub.s32 1, %v123_v8  ;;  %vm3806_vm0 = vmmov 0  }
  0x4c   :  { %338 = vmatprep.subr.bf16.mxu0 %v3487_v25  ;;  %411 = vmatprep.subr.bf16.mxu1 %v3489_v26  ;;  %v4010_v15 = vrot.slane %v120_v12, %v132_v9  ;;  %v125_v19 = vrot.slane %v120_v12, %v124_v10  ;;  %v4016_v20 = vrot.slane %v120_v12, %v136_v11  ;;  %s3807_s20 = smov [#allocation14]  }
  0x4d   :  { %v129_v23 = vrot.slane %v120_v12, %v128_v16  ;;  %s3090_s21 = sshll.u32 %s3807_s20, 4  ;;  %s3091_s21 = int_to_ptr.vmem [resolvable:$true] %s3090_s21 }
  0x4e   :  { %s3767_s22 = scalar_lea.vmem %s3091_s21, 128  ;;  %p3772_p7 = scmp.lt.s32.totalorder %s3091_s21, %s3091_s21 }
  0x4f   :  { %339 = vmatpush1.bf16.msra.mxu0 %v3491_v27  ;;  %412 = vmatpush1.bf16.msra.mxu1 %v3492_v28  ;;  %p3768_p6 = scmp.ne.s32.totalorder %s3091_s21, %s3767_s22  ;;  %p3773_p8 = scmp.lt.s32.totalorder %s3767_s22, %s3767_s22 }
  0x50   :  { %340 = vmatprep.subr.bf16.mxu0 %v3493_v29  ;;  %413 = vmatprep.subr.bf16.mxu1 %v3495_v30 }
  0x51   :  { %p3774_p9 = por %p3773_p8, %p3772_p7 }
  0x53   :  { %341 = vmatpush1.bf16.msra.mxu0 %v3497_v31  ;;  %414 = vmatpush1.bf16.msra.mxu1 %v3498_v32  ;;  %p3775_p10 = pnand %p3774_p9, %p3768_p6 }
  0x54   :  { %707 = vmatprep.subr.bf16.mxu0 %v3863_v33  ;;  %748 = vmatprep.subr.bf16.mxu1 %v3865_v34 }
  0x56   :  { %359 = vmatmul.mubr.bf16.vlgmr.msra.gmra.mxu0 %v3499_v35  ;;  %432 = vmatmul.mubr.bf16.vlgmr.msra.gmra.mxu1 %v3499_v35 }
  0x57   :  { %708 = vmatpush1.bf16.msra.mxu0 %v3867_v36  ;;  %749 = vmatpush1.bf16.msra.mxu1 %v3869_v37 }
  0x58   :  { %709 = vmatprep.subr.bf16.mxu0 %v3873_v38  ;;  %750 = vmatprep.subr.bf16.mxu1 %v3875_v39 }
  0x59   :  { %368 = vmatprep.mubr.bf16.mxu0 %v4429_v0  ;;  %441 = vmatprep.mubr.bf16.mxu1 %v4429_v0 }
  0x5b   :  { %710 = vmatpush1.bf16.msra.mxu0 %v3877_v40  ;;  %751 = vmatpush1.bf16.msra.mxu1 %v3881_v41 }
  0x5c   :  { %711 = vmatprep.subr.bf16.mxu0 %v3885_v42  ;;  %752 = vmatprep.subr.bf16.mxu1 %v3887_v43 }
  0x5e   :  { %369 = vmatmul.mubr.bf16.gmra.mxu0 %v3512_v44  ;;  %442 = vmatmul.mubr.bf16.gmra.mxu1 %v3512_v44 }
  0x5f   :  { %712 = vmatpush1.bf16.msra.mxu0 %v3891_v45  ;;  %753 = vmatpush1.bf16.msra.mxu1 %v3893_v46 }
  0x60   :  { %713 = vmatprep.subr.bf16.mxu0 %v3897_v47  ;;  %754 = vmatprep.subr.bf16.mxu1 %v3901_v48 }
  0x61   :  { %378 = vmatprep.mubr.bf16.mxu0 %v4429_v0  ;;  %451 = vmatprep.mubr.bf16.mxu1 %v4429_v0 }
  0x63   :  { %714 = vmatpush1.bf16.msra.mxu0 %v3903_v49  ;;  %755 = vmatpush1.bf16.msra.mxu1 %v3905_v50 }
  0x64   :  { %715 = vmatprep.subr.bf16.mxu0 %v3909_v51  ;;  %756 = vmatprep.subr.bf16.mxu1 %v3913_v52 }
  0x66   :  { %379 = vmatmul.mubr.bf16.gmra.mxu0 %v3525_v53  ;;  %452 = vmatmul.mubr.bf16.gmra.mxu1 %v3525_v53 }
  0x67   :  { %716 = vmatpush1.bf16.msra.mxu0 %v3917_v54  ;;  %757 = vmatpush1.bf16.msra.mxu1 %v3919_v55 }
  0x68   :  { %717 = vmatprep.subr.bf16.mxu0 %v3921_v56  ;;  %758 = vmatprep.subr.bf16.mxu1 %v3923_v57 }
  0x69   :  { %388 = vmatprep.mubr.bf16.mxu0 %v4429_v0  ;;  %461 = vmatprep.mubr.bf16.mxu1 %v4429_v0 }
  0x6b   :  { %718 = vmatpush1.bf16.msra.mxu0 %v3929_v58  ;;  %759 = vmatpush1.bf16.msra.mxu1 %v3931_v59 }
  0x6c   :  { %719 = vmatprep.subr.bf16.mxu0 %v3933_v60  ;;  %760 = vmatprep.subr.bf16.mxu1 %v3935_v61 }
  0x6e   :  { %389 = vmatmul.mubr.bf16.gmra.mxu0 %v3538_v62  ;;  %462 = vmatmul.mubr.bf16.gmra.mxu1 %v3538_v62 }
  0x6f   :  { %720 = vmatpush1.bf16.msra.mxu0 %v3943_v63  ;;  %761 = vmatpush1.bf16.msra.mxu1 %v3945_v1 }
  0x70   :  { %721 = vmatprep.subr.bf16.mxu0 %v3947_v2  ;;  %762 = vmatprep.subr.bf16.mxu1 %v3949_v3 }
  0x71   :  { %739 = vmatprep.mubr.bf16.mxu0 %v4429_v0  ;;  %780 = vmatprep.mubr.bf16.mxu1 %v4429_v0 }
  0x73   :  { %722 = vmatpush1.bf16.msra.mxu0 %v3955_v4  ;;  %763 = vmatpush1.bf16.msra.mxu1 %v3957_v5 }
  0x74   :  { %1015 = vmatprep.subr.bf16.mxu0 %v3863_v33  ;;  %1056 = vmatprep.subr.bf16.mxu1 %v3865_v34 }
  0x76   :  { %740 = vmatmul.mubr.bf16.vlgmr.msra.gmra.mxu0 %v3804_v6  ;;  %781 = vmatmul.mubr.bf16.vlgmr.msra.gmra.mxu1 %v3804_v6 }
  0x77   :  { %1016 = vmatpush1.bf16.msra.mxu0 %v3867_v36  ;;  %1057 = vmatpush1.bf16.msra.mxu1 %v3869_v37 }
  0x78   :  { %1017 = vmatprep.subr.bf16.mxu0 %v3873_v38  ;;  %1058 = vmatprep.subr.bf16.mxu1 %v3875_v39 }
  0x79   :  { %1047 = vmatprep.mubr.bf16.mxu0 %v4429_v0  ;;  %1088 = vmatprep.mubr.bf16.mxu1 %v4429_v0 }
  0x7b   :  { %1018 = vmatpush1.bf16.msra.mxu0 %v3877_v40  ;;  %1059 = vmatpush1.bf16.msra.mxu1 %v3881_v41 }
  0x7c   :  { %1019 = vmatprep.subr.bf16.mxu0 %v3885_v42  ;;  %1060 = vmatprep.subr.bf16.mxu1 %v3887_v43 }
  0x7f   :  { %1020 = vmatpush1.bf16.msra.mxu0 %v3891_v45  ;;  %1061 = vmatpush1.bf16.msra.mxu1 %v3893_v46 }
  0x80   :  { %1021 = vmatprep.subr.bf16.mxu0 %v3897_v47  ;;  %1062 = vmatprep.subr.bf16.mxu1 %v3901_v48 }
  0x83   :  { %1022 = vmatpush1.bf16.msra.mxu0 %v3903_v49  ;;  %1063 = vmatpush1.bf16.msra.mxu1 %v3905_v50 }
  0x84   :  { %1023 = vmatprep.subr.bf16.mxu0 %v3909_v51  ;;  %1064 = vmatprep.subr.bf16.mxu1 %v3913_v52 }
  0x87   :  { %1024 = vmatpush1.bf16.msra.mxu0 %v3917_v54  ;;  %1065 = vmatpush1.bf16.msra.mxu1 %v3919_v55 }
  0x88   :  { %1025 = vmatprep.subr.bf16.mxu0 %v3921_v56  ;;  %1066 = vmatprep.subr.bf16.mxu1 %v3923_v57 }
  0x8b   :  { %1026 = vmatpush1.bf16.msra.mxu0 %v3929_v58  ;;  %1067 = vmatpush1.bf16.msra.mxu1 %v3931_v59 }
  0x8c   :  { %1027 = vmatprep.subr.bf16.mxu0 %v3933_v60  ;;  %1068 = vmatprep.subr.bf16.mxu1 %v3935_v61 }
  0x8f   :  { %1028 = vmatpush1.bf16.msra.mxu0 %v3943_v63  ;;  %1069 = vmatpush1.bf16.msra.mxu1 %v3945_v1 }
  0x90   :  { %1029 = vmatprep.subr.bf16.mxu0 %v3947_v2  ;;  %1070 = vmatprep.subr.bf16.mxu1 %v3949_v3 }
  0x93   :  { %1030 = vmatpush1.bf16.msra.mxu0 %v3955_v4  ;;  %1071 = vmatpush1.bf16.msra.mxu1 %v3957_v5 }
  0x94   :  { %1323 = vmatprep.subr.bf16.mxu0 %v3863_v33  ;;  %1364 = vmatprep.subr.bf16.mxu1 %v3865_v34 }
 0x116   :  { %v4006_v13 = vpop.f32.mrf.mxu0  ;;  %v4008_v14 = vpop.f32.mrf.mxu1 }
 0x118   :  { %v4012_v17 = vpop.f32.mrf.mxu0  ;;  %v4014_v18 = vpop.f32.mrf.mxu1 }
 0x11a   :  { %v364_v21 = vpop.f32.mrf.mxu0  ;;  %v437_v22 = vpop.f32.mrf.mxu1 }
 0x11b   :  { %v4018_v24 = vadd.f32 %v364_v21, %v125_v19  ;;  %v4021_v25 = vadd.f32 %v437_v22, %v4010_v15 }
 0x11c   :  { %v366_v26 = vpop.f32.mrf.mxu0  ;;  %v439_v27 = vpop.f32.mrf.mxu1 }
 0x11d   :  { %v4023_v28 = vadd.f32 %v366_v26, %v129_v23  ;;  %v4026_v29 = vadd.f32 %v439_v27, %v4016_v20 }
 0x11e   :  { %v370_v30 = vpop.f32.mrf.mxu0  ;;  %v443_v31 = vpop.f32.mrf.mxu1 }
 0x11f   :  { %v4028_v32 = vadd.f32 %v370_v30, %v125_v19  ;;  %v4031_v35 = vadd.f32 %v443_v31, %v4010_v15 }
 0x120   :  { %v372_v44 = vpop.f32.mrf.mxu0  ;;  %v445_v53 = vpop.f32.mrf.mxu1 }
 0x121   :  { %v4033_v62 = vadd.f32 %v372_v44, %v129_v23  ;;  %v4036_v6 = vadd.f32 %v445_v53, %v4016_v20 }
 0x122   :  { %v374_v7 = vpop.f32.mrf.mxu0  ;;  %v447_v8 = vpop.f32.mrf.mxu1 }
 0x123   :  { %v4038_v9 = vadd.f32 %v374_v7, %v125_v19  ;;  %v4041_v10 = vadd.f32 %v447_v8, %v4010_v15 }
 0x124   :  { %v376_v11 = vpop.f32.mrf.mxu0  ;;  %v449_v12 = vpop.f32.mrf.mxu1 }
 0x125   :  { %4431 = vst [vmem:[#allocation19_spill] sm:$0xff] %v4038_v9  ;;  %4432 = vst [vmem:[#allocation20_spill] sm:$0xff] %v4041_v10  ;;  %v4043_v16 = vadd.f32 %v376_v11, %v129_v23  ;;  %v4046_v21 = vadd.f32 %v449_v12, %v4016_v20  ;;  %v434_v9 = vadd.f32 %v4008_v14, %v4010_v15 }
 0x126   :  { %v380_v22 = vpop.f32.mrf.mxu0  ;;  %v453_v26 = vpop.f32.mrf.mxu1 }
 0x127   :  { %4433 = vst [vmem:[#allocation21_spill] sm:$0xff] %v4043_v16  ;;  %4434 = vst [vmem:[#allocation22_spill] sm:$0xff] %v4046_v21  ;;  %v4048_v27 = vadd.f32 %v380_v22, %v125_v19  ;;  %v4051_v30 = vadd.f32 %v453_v26, %v4010_v15 }
 0x128   :  { %v382_v31 = vpop.f32.mrf.mxu0  ;;  %v455_v44 = vpop.f32.mrf.mxu1 }
 0x129   :  { %4435 = vst [vmem:[#allocation23_spill] sm:$0xff] %v4048_v27  ;;  %4436 = vst [vmem:[#allocation24_spill] sm:$0xff] %v4051_v30  ;;  %v4053_v53 = vadd.f32 %v382_v31, %v129_v23  ;;  %v4056_v7 = vadd.f32 %v455_v44, %v4016_v20 }
 0x12a   :  { %v384_v8 = vpop.f32.mrf.mxu0  ;;  %v457_v11 = vpop.f32.mrf.mxu1 }
 0x12b   :  { %4437 = vst [vmem:[#allocation25_spill] sm:$0xff] %v4053_v53  ;;  %4438 = vst [vmem:[#allocation26_spill] sm:$0xff] %v4056_v7  ;;  %v4058_v0 = vadd.f32 %v384_v8, %v125_v19  ;;  %v4061_v12 = vadd.f32 %v457_v11, %v4010_v15 }
 0x12c   :  { %v386_v21 = vpop.f32.mrf.mxu0  ;;  %v459_v22 = vpop.f32.mrf.mxu1 }
 0x12d   :  { %4439 = vst [vmem:[#allocation27_spill] sm:$0xff] %v4058_v0  ;;  %4440 = vst [vmem:[#allocation28_spill] sm:$0xff] %v4061_v12  ;;  %v4063_v27 = vadd.f32 %v386_v21, %v129_v23  ;;  %v4066_v26 = vadd.f32 %v459_v22, %v4016_v20 }
 0x12e   :  { %v390_v30 = vpop.f32.mrf.mxu0  ;;  %v463_v31 = vpop.f32.mrf.mxu1 }
 0x12f   :  { %4441 = vst [vmem:[#allocation29_spill] sm:$0xff] %v4063_v27  ;;  %4442 = vst [vmem:[#allocation30_spill] sm:$0xff] %v4066_v26  ;;  %v4068_v53 = vadd.f32 %v390_v30, %v125_v19  ;;  %v4071_v44 = vadd.f32 %v463_v31, %v4010_v15 }
 0x130   :  { %v392_v7 = vpop.f32.mrf.mxu0  ;;  %v465_v8 = vpop.f32.mrf.mxu1 }
 0x131   :  { %4443 = vst [vmem:[#allocation31_spill] sm:$0xff] %v4068_v53  ;;  %4444 = vst [vmem:[#allocation32_spill] sm:$0xff] %v4071_v44  ;;  %v4073_v0 = vadd.f32 %v392_v7, %v129_v23  ;;  %v4076_v11 = vadd.f32 %v465_v8, %v4016_v20  ;;  %v361_v53 = vadd.f32 %v4006_v13, %v125_v19 }
 0x132   :  { %v394_v12 = vpop.f32.mrf.mxu0  ;;  %v467_v21 = vpop.f32.mrf.mxu1  ;;  %v363_v8 = vadd.f32 %v4012_v17, %v129_v23 }
 0x133   :  { %4445 = vst [vmem:[#allocation33_spill] sm:$0xff] %v4073_v0  ;;  %4446 = vst [vmem:[#allocation34_spill] sm:$0xff] %v4076_v11  ;;  %v4078_v27 = vadd.f32 %v394_v12, %v125_v19  ;;  %v4081_v22 = vadd.f32 %v467_v21, %v4010_v15 }
 0x134   :  { %v396_v26 = vpop.f32.mrf.mxu0  ;;  %v469_v30 = vpop.f32.mrf.mxu1 }
 0x135   :  { %4447 = vst [vmem:[#allocation35_spill] sm:$0xff] %v4078_v27  ;;  %4448 = vst [vmem:[#allocation36_spill] sm:$0xff] %v4081_v22  ;;  %v4084_v31 = vadd.f32 %v396_v26, %v129_v23  ;;  %v4087_v44 = vadd.f32 %v469_v30, %v4016_v20 }
 0x136   :  { %v741_v7 = vpop.f32.mrf.mxu0  ;;  %v782_v0 = vpop.f32.mrf.mxu1 }
 0x137   :  { %4449 = vst [vmem:[#allocation37_spill] sm:$0xff] %v4087_v44  ;;  %v789_v11 = vadd.f32 %v741_v7, %v361_v53  ;;  %v791_v30 = vadd.f32 %v782_v0, %v434_v9  ;;  %v436_v44 = vadd.f32 %v4014_v18, %v4016_v20 }
 0x138   :  { %v743_v10 = vpop.f32.mrf.mxu0  ;;  %v784_v12 = vpop.f32.mrf.mxu1 }
 0x139   :  { %v793_v27 = vmul.f32 0.5, %v789_v11  ;;  %v790_v16 = vadd.f32 %v743_v10, %v363_v8  ;;  %v792_v17 = vadd.f32 %v784_v12, %v436_v44 }
 0x13a   :  { %v745_v21 = vpop.f32.mrf.mxu0  ;;  %v786_v22 = vpop.f32.mrf.mxu1 }
 0x13b   :  { %3607 = vtanh.f32 %v793_v27  ;;  %v797_v13 = vmul.f32 0.5, %v790_v16  ;;  %v802_v23 = vmul.f32 0.5, %v792_v17  ;;  %v4450_v21 = vmov 0  }
 0x13c   :  { %v746_v19 = vpop.f32.mrf.mxu0  ;;  %v787_v26 = vpop.f32.mrf.mxu1 }
 0x13d   :  { %3609 = vtanh.f32 %v797_v13 }
 0x13e   :  { %3611 = vtanh.f32 %v791_v30 }
 0x13f   :  { %3613 = vtanh.f32 %v802_v23 }
 0x148   :  { %v3608_v53 = vpop.eup %3607 }
 0x149   :  { %v795_v11 = vadd.f32 1.0, %v3608_v53 }
 0x14a   :  { %v3610_v10 = vpop.eup %3609 }
 0x14b   :  { %v796_v7 = vmul.f32 0.5, %v795_v11  ;;  %v799_v22 = vadd.f32 1.0, %v3610_v10  ;;  %v3612_v14 = vpop.eup %3611 }
 0x14c   :  { %v3614_v0 = vpop.eup %3613 }
 0x14d   :  { %v800_v8 = vmul.f32 0.5, %v799_v22  ;;  %v808_v16 = vmul.f32 %v3612_v14, %v796_v7  ;;  %v804_v9 = vadd.f32 1.0, %v3614_v0 }
 0x14f   :  { %v807_v15 = vmul.f32 0.0, %v800_v8  ;;  %v805_v18 = vmul.f32 0.5, %v804_v9 }
 0x151   :  { %v4094_v27 = vadd.f32 %v808_v16, %v807_v15 }
 0x153   :  { %3615 = vtanh.f32 %v4094_v27 }
 0x160   :  { %v3616_v20 = vpop.eup %3615 }
 0x161   :  { %v811_v44 = vmul.f32 %v3616_v20, %v805_v18 }
 0x163   :  { %v822_v12 = vpack.c.bf16 %v811_v44, %v811_v44 }
 0x165   :  { %1048 = vmatmul.mubr.bf16.vlgmr.msra.gmra.mxu0 %v822_v12  ;;  %1089 = vmatmul.mubr.bf16.vlgmr.msra.gmra.mxu1 %v822_v12 }
 0x166   :  { %1324 = vmatpush1.bf16.msra.mxu0 %v3867_v36  ;;  %1365 = vmatpush1.bf16.msra.mxu1 %v3869_v37 }
 0x167   :  { %1325 = vmatprep.subr.bf16.mxu0 %v3873_v38  ;;  %1366 = vmatprep.subr.bf16.mxu1 %v3875_v39 }
 0x168   :  { %1355 = vmatprep.mubr.bf16.mxu0 %v4450_v21  ;;  %1396 = vmatprep.mubr.bf16.mxu1 %v4450_v21 }
 0x16a   :  { %1326 = vmatpush1.bf16.msra.mxu0 %v3877_v40  ;;  %1367 = vmatpush1.bf16.msra.mxu1 %v3881_v41 }
 0x16b   :  { %1327 = vmatprep.subr.bf16.mxu0 %v3885_v42  ;;  %1368 = vmatprep.subr.bf16.mxu1 %v3887_v43 }
 0x16e   :  { %1328 = vmatpush1.bf16.msra.mxu0 %v3891_v45  ;;  %1369 = vmatpush1.bf16.msra.mxu1 %v3893_v46 }
 0x16f   :  { %1329 = vmatprep.subr.bf16.mxu0 %v3897_v47  ;;  %1370 = vmatprep.subr.bf16.mxu1 %v3901_v48 }
 0x172   :  { %1330 = vmatpush1.bf16.msra.mxu0 %v3903_v49  ;;  %1371 = vmatpush1.bf16.msra.mxu1 %v3905_v50 }
 0x173   :  { %1331 = vmatprep.subr.bf16.mxu0 %v3909_v51  ;;  %1372 = vmatprep.subr.bf16.mxu1 %v3913_v52 }
 0x176   :  { %1332 = vmatpush1.bf16.msra.mxu0 %v3917_v54  ;;  %1373 = vmatpush1.bf16.msra.mxu1 %v3919_v55 }
 0x177   :  { %1333 = vmatprep.subr.bf16.mxu0 %v3921_v56  ;;  %1374 = vmatprep.subr.bf16.mxu1 %v3923_v57 }
 0x17a   :  { %1334 = vmatpush1.bf16.msra.mxu0 %v3929_v58  ;;  %1375 = vmatpush1.bf16.msra.mxu1 %v3931_v59 }
 0x17b   :  { %1335 = vmatprep.subr.bf16.mxu0 %v3933_v60  ;;  %1376 = vmatprep.subr.bf16.mxu1 %v3935_v61 }
 0x17e   :  { %1336 = vmatpush1.bf16.msra.mxu0 %v3943_v63  ;;  %1377 = vmatpush1.bf16.msra.mxu1 %v3945_v1 }
 0x17f   :  { %1337 = vmatprep.subr.bf16.mxu0 %v3947_v2  ;;  %1378 = vmatprep.subr.bf16.mxu1 %v3949_v3 }
 0x182   :  { %1338 = vmatpush1.bf16.msra.mxu0 %v3955_v4  ;;  %1379 = vmatpush1.bf16.msra.mxu1 %v3957_v5 }
 0x183   :  { %1631 = vmatprep.subr.bf16.mxu0 %v3863_v33  ;;  %1672 = vmatprep.subr.bf16.mxu1 %v3865_v34 }
 0x225   :  { %v1049_v13 = vpop.f32.mrf.mxu0  ;;  %v1090_v19 = vpop.f32.mrf.mxu1 }
 0x226   :  { %v1097_v26 = vadd.f32 %v1049_v13, %v4018_v24  ;;  %v1099_v7 = vadd.f32 %v1090_v19, %v4021_v25 }
 0x227   :  { %v1051_v30 = vpop.f32.mrf.mxu0  ;;  %v1092_v17 = vpop.f32.mrf.mxu1 }
 0x228   :  { %v1101_v23 = vmul.f32 0.5, %v1097_v26  ;;  %v1098_v53 = vadd.f32 %v1051_v30, %v4023_v28  ;;  %v1100_v33 = vadd.f32 %v1092_v17, %v4026_v29  ;;  %v4193_v17 = vld [vmem:[#allocation11 + $0xc4] ss:$16 sps:$4 sm:$0xff]  }
 0x229   :  { %v1053_v11 = vpop.f32.mrf.mxu0  ;;  %v1094_v10 = vpop.f32.mrf.mxu1 }
 0x22a   :  { %3617 = vtanh.f32 %v1101_v23  ;;  %v1105_v22 = vmul.f32 0.5, %v1098_v53  ;;  %v1110_v34 = vmul.f32 0.5, %v1100_v33  ;;  %v4195_v23 = vld [vmem:[#allocation11 + $0xcc] ss:$16 sps:$4 sm:$0xff]   ;;  %v4197_v53 = vld [vmem:[#allocation11 + $0xc0] ss:$16 sps:$4 sm:$0xff]  }
 0x22b   :  { %v1054_v8 = vpop.f32.mrf.mxu0  ;;  %v1095_v14 = vpop.f32.mrf.mxu1  ;;  %v4199_v11 = vld [vmem:[#allocation11 + $0xc8] ss:$16 sps:$4 sm:$0xff]   ;;  %v4205_v10 = vld [vmem:[#allocation11 + $0xa4] ss:$16 sps:$4 sm:$0xff]   ;;  %v4219_v33 = vld [vmem:[#allocation11 + $0x8c] ss:$16 sps:$4 sm:$0xff]  }
 0x22c   :  { %3619 = vtanh.f32 %v1105_v22  ;;  %v4209_v22 = vld [vmem:[#allocation11 + $0xa0] ss:$16 sps:$4 sm:$0xff]   ;;  %v4211_v8 = vld [vmem:[#allocation11 + $0xa8] ss:$16 sps:$4 sm:$0xff]   ;;  %v4217_v14 = vld [vmem:[#allocation11 + $0x84] ss:$16 sps:$4 sm:$0xff]  }
 0x22d   :  { %3621 = vtanh.f32 %v1099_v7  ;;  %v4207_v7 = vld [vmem:[#allocation11 + $0xac] ss:$16 sps:$4 sm:$0xff]  }
 0x22e   :  { %3623 = vtanh.f32 %v1110_v34  ;;  %v4221_v34 = vld [vmem:[#allocation11 + $0x80] ss:$16 sps:$4 sm:$0xff]  }
 0x237   :  { %v3618_v15 = vpop.eup %3617 }
 0x238   :  { %v1103_v24 = vadd.f32 1.0, %v3618_v15  ;;  %v4223_v15 = vld [vmem:[#allocation11 + $0x88] ss:$16 sps:$4 sm:$0xff]  }
 0x239   :  { %v3620_v16 = vpop.eup %3619 }
 0x23a   :  { %v1104_v0 = vmul.f32 0.5, %v1103_v24  ;;  %v1107_v9 = vadd.f32 1.0, %v3620_v16  ;;  %v3622_v28 = vpop.eup %3621  ;;  %v4229_v24 = vld [vmem:[#allocation11 + $0x64] ss:$16 sps:$4 sm:$0xff]   ;;  %v4231_v16 = vld [vmem:[#allocation11 + $0x6c] ss:$16 sps:$4 sm:$0xff]  }
 0x23b   :  { %v3624_v12 = vpop.eup %3623 }
 0x23c   :  { %v1108_v18 = vmul.f32 0.5, %v1107_v9  ;;  %v1116_v20 = vmul.f32 %v3622_v28, %v1104_v0  ;;  %v1112_v13 = vadd.f32 1.0, %v3624_v12  ;;  %v4233_v0 = vld [vmem:[#allocation11 + $0x60] ss:$16 sps:$4 sm:$0xff]   ;;  %v4235_v9 = vld [vmem:[#allocation11 + $0x68] ss:$16 sps:$4 sm:$0xff]  }
 0x23d   :  { %v4241_v28 = vld [vmem:[#allocation11 + $0x44] ss:$16 sps:$4 sm:$0xff]   ;;  %v4255_v12 = vld [vmem:[#allocation11 + $0x2c] ss:$16 sps:$4 sm:$0xff]  }
 0x23e   :  { %v1115_v44 = vmul.f32 %v1108_v18, %v4094_v27  ;;  %v1113_v19 = vmul.f32 0.5, %v1112_v13  ;;  %v4187_v27 = vld [vmem:[#allocation11 + $0xe8] ss:$16 sps:$4 sm:$0xff]   ;;  %v4243_v18 = vld [vmem:[#allocation11 + $0x4c] ss:$16 sps:$4 sm:$0xff]  }
 0x23f   :  { %v4257_v13 = vld [vmem:[#allocation11 + $0x20] ss:$16 sps:$4 sm:$0xff]  }
 0x240   :  { %v4136_v25 = vadd.f32 %v1116_v20, %v1115_v44  ;;  %v4245_v20 = vld [vmem:[#allocation11 + $0x40] ss:$16 sps:$4 sm:$0xff]   ;;  %v4247_v44 = vld [vmem:[#allocation11 + $0x48] ss:$16 sps:$4 sm:$0xff]  }
 0x242   :  { %3625 = vtanh.f32 %v4136_v25 }
 0x24f   :  { %v3626_v29 = vpop.eup %3625 }
 0x250   :  { %v1119_v26 = vmul.f32 %v3626_v29, %v1113_v19  ;;  %v4259_v19 = vld [vmem:[#allocation11 + $0x28] ss:$16 sps:$4 sm:$0xff]   ;;  %v4265_v29 = vld [vmem:[#allocation11 + $0x4] ss:$16 sps:$4 sm:$0xff]  }
 0x252   :  { %v1130_v30 = vpack.c.bf16 %v1119_v26, %v1119_v26  ;;  %v4267_v26 = vld [vmem:[#allocation11 + $0xc] ss:$16 sps:$4 sm:$0xff]  }
 0x254   :  { %1356 = vmatmul.mubr.bf16.vlgmr.msra.gmra.mxu0 %v1130_v30  ;;  %1397 = vmatmul.mubr.bf16.vlgmr.msra.gmra.mxu1 %v1130_v30  ;;  %v4269_v30 = vld [vmem:[#allocation11] ss:$16 sps:$4 sm:$0xff]  }
 0x255   :  { %1632 = vmatpush1.bf16.msra.mxu0 %v3867_v36  ;;  %1673 = vmatpush1.bf16.msra.mxu1 %v3869_v37 }
 0x256   :  { %1633 = vmatprep.subr.bf16.mxu0 %v3873_v38  ;;  %1674 = vmatprep.subr.bf16.mxu1 %v3875_v39 }
 0x257   :  { %1663 = vmatprep.mubr.bf16.mxu0 %v4450_v21  ;;  %1704 = vmatprep.mubr.bf16.mxu1 %v4450_v21 }
 0x259   :  { %1634 = vmatpush1.bf16.msra.mxu0 %v3877_v40  ;;  %1675 = vmatpush1.bf16.msra.mxu1 %v3881_v41 }
 0x25a   :  { %1635 = vmatprep.subr.bf16.mxu0 %v3885_v42  ;;  %1676 = vmatprep.subr.bf16.mxu1 %v3887_v43 }
 0x25d   :  { %1636 = vmatpush1.bf16.msra.mxu0 %v3891_v45  ;;  %1677 = vmatpush1.bf16.msra.mxu1 %v3893_v46 }
 0x25e   :  { %1637 = vmatprep.subr.bf16.mxu0 %v3897_v47  ;;  %1678 = vmatprep.subr.bf16.mxu1 %v3901_v48 }
 0x261   :  { %1638 = vmatpush1.bf16.msra.mxu0 %v3903_v49  ;;  %1679 = vmatpush1.bf16.msra.mxu1 %v3905_v50 }
 0x262   :  { %1639 = vmatprep.subr.bf16.mxu0 %v3909_v51  ;;  %1680 = vmatprep.subr.bf16.mxu1 %v3913_v52 }
 0x265   :  { %1640 = vmatpush1.bf16.msra.mxu0 %v3917_v54  ;;  %1681 = vmatpush1.bf16.msra.mxu1 %v3919_v55 }
 0x266   :  { %1641 = vmatprep.subr.bf16.mxu0 %v3921_v56  ;;  %1682 = vmatprep.subr.bf16.mxu1 %v3923_v57 }
 0x269   :  { %1642 = vmatpush1.bf16.msra.mxu0 %v3929_v58  ;;  %1683 = vmatpush1.bf16.msra.mxu1 %v3931_v59 }
 0x26a   :  { %1643 = vmatprep.subr.bf16.mxu0 %v3933_v60  ;;  %1684 = vmatprep.subr.bf16.mxu1 %v3935_v61 }
 0x26d   :  { %1644 = vmatpush1.bf16.msra.mxu0 %v3943_v63  ;;  %1685 = vmatpush1.bf16.msra.mxu1 %v3945_v1 }
 0x26e   :  { %1645 = vmatprep.subr.bf16.mxu0 %v3947_v2  ;;  %1686 = vmatprep.subr.bf16.mxu1 %v3949_v3 }
 0x271   :  { %1646 = vmatpush1.bf16.msra.mxu0 %v3955_v4  ;;  %1687 = vmatpush1.bf16.msra.mxu1 %v3957_v5 }
 0x314   :  { %v1357_v36 = vpop.f32.mrf.mxu0  ;;  %v1398_v37 = vpop.f32.mrf.mxu1 }
 0x315   :  { %v1405_v38 = vadd.f32 %v1357_v36, %v4028_v32  ;;  %v1407_v46 = vadd.f32 %v1398_v37, %v4031_v35  ;;  %v4181_v35 = vld [vmem:[#allocation11 + $0xe4] ss:$16 sps:$4 sm:$0xff]   ;;  %v4271_v36 = vld [vmem:[#allocation11 + $0x8] ss:$16 sps:$4 sm:$0xff]  }
 0x316   :  { %v1359_v39 = vpop.f32.mrf.mxu0  ;;  %v1400_v40 = vpop.f32.mrf.mxu1  ;;  %1939 = vmatprep.subr.bf16.mxu0 %v4181_v35 }
 0x317   :  { %v1409_v41 = vmul.f32 0.5, %v1405_v38  ;;  %v1406_v42 = vadd.f32 %v1359_v39, %v4033_v62  ;;  %v1408_v50 = vadd.f32 %v1400_v40, %v4036_v6  ;;  %v4183_v62 = vld [vmem:[#allocation11 + $0xec] ss:$16 sps:$4 sm:$0xff]   ;;  %v4185_v6 = vld [vmem:[#allocation11 + $0xe0] ss:$16 sps:$4 sm:$0xff]  }
 0x318   :  { %v1361_v43 = vpop.f32.mrf.mxu0  ;;  %v1402_v45 = vpop.f32.mrf.mxu1  ;;  %1980 = vmatprep.subr.bf16.mxu1 %v4183_v62  ;;  %v4451_v39 = vld [vmem:[#allocation19_spill] sm:$0xff] }
 0x319   :  { %3627 = vtanh.f32 %v1409_v41  ;;  %v1413_v47 = vmul.f32 0.5, %v1406_v42  ;;  %v1418_v51 = vmul.f32 0.5, %v1408_v50  ;;  %v4452_v45 = vld [vmem:[#allocation21_spill] sm:$0xff] }
 0x31a   :  { %v1362_v48 = vpop.f32.mrf.mxu0  ;;  %v1403_v49 = vpop.f32.mrf.mxu1 }
 0x31b   :  { %3629 = vtanh.f32 %v1413_v47  ;;  %v4453_v49 = vld [vmem:[#allocation20_spill] sm:$0xff] }
 0x31c   :  { %3631 = vtanh.f32 %v1407_v46 }
 0x31d   :  { %3633 = vtanh.f32 %v1418_v51 }
 0x326   :  { %v3628_v52 = vpop.eup %3627 }
 0x327   :  { %v1411_v54 = vadd.f32 1.0, %v3628_v52 }
 0x328   :  { %v3630_v55 = vpop.eup %3629 }
 0x329   :  { %v1412_v56 = vmul.f32 0.5, %v1411_v54  ;;  %v1415_v57 = vadd.f32 1.0, %v3630_v55  ;;  %v3632_v58 = vpop.eup %3631  ;;  %v4454_v55 = vld [vmem:[#allocation22_spill] sm:$0xff] }
 0x32a   :  { %v3634_v1 = vpop.eup %3633 }
 0x32b   :  { %v1416_v59 = vmul.f32 0.5, %v1415_v57  ;;  %v1424_v60 = vmul.f32 %v3632_v58, %v1412_v56  ;;  %v1420_v2 = vadd.f32 1.0, %v3634_v1 }
 0x32d   :  { %v1423_v61 = vmul.f32 %v1416_v59, %v4136_v25  ;;  %v1421_v3 = vmul.f32 0.5, %v1420_v2  ;;  %v4253_v25 = vld [vmem:[#allocation11 + $0x24] ss:$16 sps:$4 sm:$0xff]  }
 0x32f   :  { %v4176_v63 = vadd.f32 %v1424_v60, %v1423_v61 }
 0x331   :  { %3635 = vtanh.f32 %v4176_v63 }
 0x33e   :  { %v3636_v4 = vpop.eup %3635 }
 0x33f   :  { %v1427_v5 = vmul.f32 %v3636_v4, %v1421_v3 }
 0x341   :  { %v1438_v32 = vpack.c.bf16 %v1427_v5, %v1427_v5 }
 0x343   :  { %1664 = vmatmul.mubr.bf16.vlgmr.msra.gmra.mxu0 %v1438_v32  ;;  %1705 = vmatmul.mubr.bf16.vlgmr.msra.gmra.mxu1 %v1438_v32 }
 0x344   :  { %1971 = vmatprep.mubr.bf16.mxu0 %v4450_v21  ;;  %2012 = vmatprep.mubr.bf16.mxu1 %v4450_v21 }
 0x345   :  { %1940 = vmatpush1.bf16.msra.mxu0 %v4185_v6  ;;  %1981 = vmatpush1.bf16.msra.mxu1 %v4187_v27 }
 0x346   :  { %1941 = vmatprep.subr.bf16.mxu0 %v4193_v17  ;;  %1982 = vmatprep.subr.bf16.mxu1 %v4195_v23 }
 0x349   :  { %1942 = vmatpush1.bf16.msra.mxu0 %v4197_v53  ;;  %1983 = vmatpush1.bf16.msra.mxu1 %v4199_v11 }
 0x34a   :  { %1943 = vmatprep.subr.bf16.mxu0 %v4205_v10  ;;  %1984 = vmatprep.subr.bf16.mxu1 %v4207_v7 }
 0x34d   :  { %1944 = vmatpush1.bf16.msra.mxu0 %v4209_v22  ;;  %1985 = vmatpush1.bf16.msra.mxu1 %v4211_v8 }
 0x34e   :  { %1945 = vmatprep.subr.bf16.mxu0 %v4217_v14  ;;  %1986 = vmatprep.subr.bf16.mxu1 %v4219_v33 }
 0x351   :  { %1946 = vmatpush1.bf16.msra.mxu0 %v4221_v34  ;;  %1987 = vmatpush1.bf16.msra.mxu1 %v4223_v15 }
 0x352   :  { %1947 = vmatprep.subr.bf16.mxu0 %v4229_v24  ;;  %1988 = vmatprep.subr.bf16.mxu1 %v4231_v16 }
 0x355   :  { %1948 = vmatpush1.bf16.msra.mxu0 %v4233_v0  ;;  %1989 = vmatpush1.bf16.msra.mxu1 %v4235_v9 }
 0x356   :  { %1949 = vmatprep.subr.bf16.mxu0 %v4241_v28  ;;  %1990 = vmatprep.subr.bf16.mxu1 %v4243_v18 }
 0x359   :  { %1950 = vmatpush1.bf16.msra.mxu0 %v4245_v20  ;;  %1991 = vmatpush1.bf16.msra.mxu1 %v4247_v44 }
 0x35a   :  { %1951 = vmatprep.subr.bf16.mxu0 %v4253_v25  ;;  %1992 = vmatprep.subr.bf16.mxu1 %v4255_v12 }
 0x35d   :  { %1952 = vmatpush1.bf16.msra.mxu0 %v4257_v13  ;;  %1993 = vmatpush1.bf16.msra.mxu1 %v4259_v19 }
 0x35e   :  { %1953 = vmatprep.subr.bf16.mxu0 %v4265_v29  ;;  %1994 = vmatprep.subr.bf16.mxu1 %v4267_v26 }
 0x361   :  { %1954 = vmatpush1.bf16.msra.mxu0 %v4269_v30  ;;  %1995 = vmatpush1.bf16.msra.mxu1 %v4271_v36 }
 0x362   :  { %2247 = vmatprep.subr.bf16.mxu0 %v4181_v35  ;;  %2288 = vmatprep.subr.bf16.mxu1 %v4183_v62 }
 0x403   :  { %v1665_v37 = vpop.f32.mrf.mxu0  ;;  %v1706_v38 = vpop.f32.mrf.mxu1 }
 0x404   :  { %v1713_v40 = vadd.f32 %v1665_v37, %v4451_v39  ;;  %v1715_v50 = vadd.f32 %v1706_v38, %v4453_v49 }
 0x405   :  { %v1667_v41 = vpop.f32.mrf.mxu0  ;;  %v1708_v42 = vpop.f32.mrf.mxu1 }
 0x406   :  { %v1717_v43 = vmul.f32 0.5, %v1713_v40  ;;  %v1714_v46 = vadd.f32 %v1667_v41, %v4452_v45  ;;  %v1716_v56 = vadd.f32 %v1708_v42, %v4454_v55  ;;  %v4455_v45 = vld [vmem:[#allocation23_spill] sm:$0xff]  ;;  %v4457_v55 = vld [vmem:[#allocation24_spill] sm:$0xff] }
 0x407   :  { %v1669_v47 = vpop.f32.mrf.mxu0  ;;  %v1710_v48 = vpop.f32.mrf.mxu1 }
 0x408   :  { %3637 = vtanh.f32 %v1717_v43  ;;  %v1721_v51 = vmul.f32 0.5, %v1714_v46  ;;  %v1726_v57 = vmul.f32 0.5, %v1716_v56 }
 0x409   :  { %v1670_v52 = vpop.f32.mrf.mxu0  ;;  %v1711_v54 = vpop.f32.mrf.mxu1 }
 0x40a   :  { %3639 = vtanh.f32 %v1721_v51 }
 0x40b   :  { %3641 = vtanh.f32 %v1715_v50  ;;  %v4456_v50 = vld [vmem:[#allocation25_spill] sm:$0xff] }
 0x40c   :  { %3643 = vtanh.f32 %v1726_v57 }
 0x415   :  { %v3638_v58 = vpop.eup %3637 }
 0x416   :  { %v1719_v59 = vadd.f32 1.0, %v3638_v58 }
 0x417   :  { %v3640_v60 = vpop.eup %3639 }
 0x418   :  { %v1720_v61 = vmul.f32 0.5, %v1719_v59  ;;  %v1723_v1 = vadd.f32 1.0, %v3640_v60  ;;  %v3642_v2 = vpop.eup %3641  ;;  %v4458_v60 = vld [vmem:[#allocation26_spill] sm:$0xff] }
 0x419   :  { %v3644_v37 = vpop.eup %3643 }
 0x41a   :  { %v1724_v3 = vmul.f32 0.5, %v1723_v1  ;;  %v1732_v4 = vmul.f32 %v3642_v2, %v1720_v61  ;;  %v1728_v38 = vadd.f32 1.0, %v3644_v37 }
 0x41c   :  { %v1731_v5 = vmul.f32 %v1724_v3, %v4176_v63  ;;  %v1729_v39 = vmul.f32 0.5, %v1728_v38 }
 0x41e   :  { %v4284_v32 = vadd.f32 %v1732_v4, %v1731_v5 }
 0x420   :  { %3645 = vtanh.f32 %v4284_v32 }
 0x42d   :  { %v3646_v40 = vpop.eup %3645 }
 0x42e   :  { %v1735_v41 = vmul.f32 %v3646_v40, %v1729_v39 }
 0x430   :  { %v1746_v42 = vpack.c.bf16 %v1735_v41, %v1735_v41 }
 0x432   :  { %1972 = vmatmul.mubr.bf16.vlgmr.msra.gmra.mxu0 %v1746_v42  ;;  %2013 = vmatmul.mubr.bf16.vlgmr.msra.gmra.mxu1 %v1746_v42 }
 0x433   :  { %2248 = vmatpush1.bf16.msra.mxu0 %v4185_v6  ;;  %2289 = vmatpush1.bf16.msra.mxu1 %v4187_v27 }
 0x434   :  { %2249 = vmatprep.subr.bf16.mxu0 %v4193_v17  ;;  %2290 = vmatprep.subr.bf16.mxu1 %v4195_v23 }
 0x435   :  { %2279 = vmatprep.mubr.bf16.mxu0 %v4450_v21  ;;  %2320 = vmatprep.mubr.bf16.mxu1 %v4450_v21 }
 0x437   :  { %2250 = vmatpush1.bf16.msra.mxu0 %v4197_v53  ;;  %2291 = vmatpush1.bf16.msra.mxu1 %v4199_v11 }
 0x438   :  { %2251 = vmatprep.subr.bf16.mxu0 %v4205_v10  ;;  %2292 = vmatprep.subr.bf16.mxu1 %v4207_v7 }
 0x43b   :  { %2252 = vmatpush1.bf16.msra.mxu0 %v4209_v22  ;;  %2293 = vmatpush1.bf16.msra.mxu1 %v4211_v8 }
 0x43c   :  { %2253 = vmatprep.subr.bf16.mxu0 %v4217_v14  ;;  %2294 = vmatprep.subr.bf16.mxu1 %v4219_v33 }
 0x43f   :  { %2254 = vmatpush1.bf16.msra.mxu0 %v4221_v34  ;;  %2295 = vmatpush1.bf16.msra.mxu1 %v4223_v15 }
 0x440   :  { %2255 = vmatprep.subr.bf16.mxu0 %v4229_v24  ;;  %2296 = vmatprep.subr.bf16.mxu1 %v4231_v16 }
 0x443   :  { %2256 = vmatpush1.bf16.msra.mxu0 %v4233_v0  ;;  %2297 = vmatpush1.bf16.msra.mxu1 %v4235_v9 }
 0x444   :  { %2257 = vmatprep.subr.bf16.mxu0 %v4241_v28  ;;  %2298 = vmatprep.subr.bf16.mxu1 %v4243_v18 }
 0x447   :  { %2258 = vmatpush1.bf16.msra.mxu0 %v4245_v20  ;;  %2299 = vmatpush1.bf16.msra.mxu1 %v4247_v44 }
 0x448   :  { %2259 = vmatprep.subr.bf16.mxu0 %v4253_v25  ;;  %2300 = vmatprep.subr.bf16.mxu1 %v4255_v12 }
 0x44b   :  { %2260 = vmatpush1.bf16.msra.mxu0 %v4257_v13  ;;  %2301 = vmatpush1.bf16.msra.mxu1 %v4259_v19 }
 0x44c   :  { %2261 = vmatprep.subr.bf16.mxu0 %v4265_v29  ;;  %2302 = vmatprep.subr.bf16.mxu1 %v4267_v26 }
 0x44f   :  { %2262 = vmatpush1.bf16.msra.mxu0 %v4269_v30  ;;  %2303 = vmatpush1.bf16.msra.mxu1 %v4271_v36 }
 0x450   :  { %2555 = vmatprep.subr.bf16.mxu0 %v4181_v35  ;;  %2596 = vmatprep.subr.bf16.mxu1 %v4183_v62 }
 0x4f2   :  { %v1973_v63 = vpop.f32.mrf.mxu0  ;;  %v2014_v43 = vpop.f32.mrf.mxu1 }
 0x4f3   :  { %v2021_v46 = vadd.f32 %v1973_v63, %v4455_v45  ;;  %v2023_v56 = vadd.f32 %v2014_v43, %v4457_v55 }
 0x4f4   :  { %v1975_v47 = vpop.f32.mrf.mxu0  ;;  %v2016_v48 = vpop.f32.mrf.mxu1 }
 0x4f5   :  { %v2025_v49 = vmul.f32 0.5, %v2021_v46  ;;  %v2022_v51 = vadd.f32 %v1975_v47, %v4456_v50  ;;  %v2024_v61 = vadd.f32 %v2016_v48, %v4458_v60  ;;  %v4459_v50 = vld [vmem:[#allocation27_spill] sm:$0xff]  ;;  %v4461_v60 = vld [vmem:[#allocation28_spill] sm:$0xff] }
 0x4f6   :  { %v1977_v52 = vpop.f32.mrf.mxu0  ;;  %v2018_v54 = vpop.f32.mrf.mxu1 }
 0x4f7   :  { %3647 = vtanh.f32 %v2025_v49  ;;  %v2029_v57 = vmul.f32 0.5, %v2022_v51  ;;  %v2034_v1 = vmul.f32 0.5, %v2024_v61 }
 0x4f8   :  { %v1978_v58 = vpop.f32.mrf.mxu0  ;;  %v2019_v59 = vpop.f32.mrf.mxu1 }
 0x4f9   :  { %3649 = vtanh.f32 %v2029_v57 }
 0x4fa   :  { %3651 = vtanh.f32 %v2023_v56  ;;  %v4460_v56 = vld [vmem:[#allocation29_spill] sm:$0xff] }
 0x4fb   :  { %3653 = vtanh.f32 %v2034_v1 }
 0x504   :  { %v3648_v2 = vpop.eup %3647 }
 0x505   :  { %v2027_v3 = vadd.f32 1.0, %v3648_v2 }
 0x506   :  { %v3650_v4 = vpop.eup %3649 }
 0x507   :  { %v2028_v5 = vmul.f32 0.5, %v2027_v3  ;;  %v2031_v37 = vadd.f32 1.0, %v3650_v4  ;;  %v3652_v38 = vpop.eup %3651 }
 0x508   :  { %v3654_v63 = vpop.eup %3653 }
 0x509   :  { %v2032_v39 = vmul.f32 0.5, %v2031_v37  ;;  %v2040_v40 = vmul.f32 %v3652_v38, %v2028_v5  ;;  %v2036_v43 = vadd.f32 1.0, %v3654_v63 }
 0x50b   :  { %v2039_v41 = vmul.f32 %v2032_v39, %v4284_v32  ;;  %v2037_v45 = vmul.f32 0.5, %v2036_v43 }
 0x50d   :  { %v4326_v42 = vadd.f32 %v2040_v40, %v2039_v41 }
 0x50f   :  { %3655 = vtanh.f32 %v4326_v42 }
 0x51c   :  { %v3656_v46 = vpop.eup %3655 }
 0x51d   :  { %v2043_v47 = vmul.f32 %v3656_v46, %v2037_v45 }
 0x51f   :  { %v2054_v48 = vpack.c.bf16 %v2043_v47, %v2043_v47 }
 0x521   :  { %2280 = vmatmul.mubr.bf16.vlgmr.msra.gmra.mxu0 %v2054_v48  ;;  %2321 = vmatmul.mubr.bf16.vlgmr.msra.gmra.mxu1 %v2054_v48 }
 0x522   :  { %2556 = vmatpush1.bf16.msra.mxu0 %v4185_v6  ;;  %2597 = vmatpush1.bf16.msra.mxu1 %v4187_v27 }
 0x523   :  { %2557 = vmatprep.subr.bf16.mxu0 %v4193_v17  ;;  %2598 = vmatprep.subr.bf16.mxu1 %v4195_v23 }
 0x524   :  { %2587 = vmatprep.mubr.bf16.mxu0 %v4450_v21  ;;  %2628 = vmatprep.mubr.bf16.mxu1 %v4450_v21 }
 0x526   :  { %2558 = vmatpush1.bf16.msra.mxu0 %v4197_v53  ;;  %2599 = vmatpush1.bf16.msra.mxu1 %v4199_v11 }
 0x527   :  { %2559 = vmatprep.subr.bf16.mxu0 %v4205_v10  ;;  %2600 = vmatprep.subr.bf16.mxu1 %v4207_v7 }
 0x52a   :  { %2560 = vmatpush1.bf16.msra.mxu0 %v4209_v22  ;;  %2601 = vmatpush1.bf16.msra.mxu1 %v4211_v8 }
 0x52b   :  { %2561 = vmatprep.subr.bf16.mxu0 %v4217_v14  ;;  %2602 = vmatprep.subr.bf16.mxu1 %v4219_v33 }
 0x52e   :  { %2562 = vmatpush1.bf16.msra.mxu0 %v4221_v34  ;;  %2603 = vmatpush1.bf16.msra.mxu1 %v4223_v15 }
 0x52f   :  { %2563 = vmatprep.subr.bf16.mxu0 %v4229_v24  ;;  %2604 = vmatprep.subr.bf16.mxu1 %v4231_v16 }
 0x532   :  { %2564 = vmatpush1.bf16.msra.mxu0 %v4233_v0  ;;  %2605 = vmatpush1.bf16.msra.mxu1 %v4235_v9 }
 0x533   :  { %2565 = vmatprep.subr.bf16.mxu0 %v4241_v28  ;;  %2606 = vmatprep.subr.bf16.mxu1 %v4243_v18 }
 0x536   :  { %2566 = vmatpush1.bf16.msra.mxu0 %v4245_v20  ;;  %2607 = vmatpush1.bf16.msra.mxu1 %v4247_v44 }
 0x537   :  { %2567 = vmatprep.subr.bf16.mxu0 %v4253_v25  ;;  %2608 = vmatprep.subr.bf16.mxu1 %v4255_v12 }
 0x53a   :  { %2568 = vmatpush1.bf16.msra.mxu0 %v4257_v13  ;;  %2609 = vmatpush1.bf16.msra.mxu1 %v4259_v19 }
 0x53b   :  { %2569 = vmatprep.subr.bf16.mxu0 %v4265_v29  ;;  %2610 = vmatprep.subr.bf16.mxu1 %v4267_v26 }
 0x53e   :  { %2570 = vmatpush1.bf16.msra.mxu0 %v4269_v30  ;;  %2611 = vmatpush1.bf16.msra.mxu1 %v4271_v36 }
 0x53f   :  { %2863 = vmatprep.subr.bf16.mxu0 %v4181_v35  ;;  %2904 = vmatprep.subr.bf16.mxu1 %v4183_v62  ;;  %v4462_v35 = vld [vmem:[#allocation30_spill] sm:$0xff] }
 0x5e1   :  { %v2281_v32 = vpop.f32.mrf.mxu0  ;;  %v2322_v49 = vpop.f32.mrf.mxu1 }
 0x5e2   :  { %v2329_v51 = vadd.f32 %v2281_v32, %v4459_v50  ;;  %v2331_v61 = vadd.f32 %v2322_v49, %v4461_v60  ;;  %v3602_v60 = vld [vmem:[#allocation12 + $0x20] sm:$0xff]  }
 0x5e3   :  { %v2283_v52 = vpop.f32.mrf.mxu0  ;;  %v2324_v54 = vpop.f32.mrf.mxu1 }
 0x5e4   :  { %v2333_v55 = vmul.f32 0.5, %v2329_v51  ;;  %v2330_v57 = vadd.f32 %v2283_v52, %v4460_v56  ;;  %v2332_v62 = vadd.f32 %v2324_v54, %v4462_v35  ;;  %v3599_v56 = vld [vmem:[#allocation12 + $0x38] sm:$0xff]  }
 0x5e5   :  { %v2285_v58 = vpop.f32.mrf.mxu0  ;;  %v2326_v59 = vpop.f32.mrf.mxu1 }
 0x5e6   :  { %3657 = vtanh.f32 %v2333_v55  ;;  %v2337_v1 = vmul.f32 0.5, %v2330_v57  ;;  %v2342_v4 = vmul.f32 0.5, %v2332_v62  ;;  %v3805_v57 = vmov 0.0   ;;  %v3600_v58 = vld [vmem:[#allocation12 + $0x30] sm:$0xff]   ;;  %v3601_v59 = vld [vmem:[#allocation12 + $0x28] sm:$0xff]  }
 0x5e7   :  { %v2286_v2 = vpop.f32.mrf.mxu0  ;;  %v2327_v3 = vpop.f32.mrf.mxu1 }
 0x5e8   :  { %3659 = vtanh.f32 %v2337_v1  ;;  %v3604_v1 = vld [vmem:[#allocation12 + $0x10] sm:$0xff]   ;;  %v3605_v2 = vld [vmem:[#allocation12 + $0x8] sm:$0xff]   ;;  %v3606_v3 = vld [vmem:[#allocation12] sm:$0xff]  }
 0x5e9   :  { %3661 = vtanh.f32 %v2331_v61  ;;  %v3603_v61 = vld [vmem:[#allocation12 + $0x18] sm:$0xff]  }
 0x5ea   :  { %3663 = vtanh.f32 %v2342_v4  ;;  %v4467_v4 = vld [vmem:[#allocation35_spill] sm:$0xff] }
 0x5f3   :  { %v3658_v5 = vpop.eup %3657 }
 0x5f4   :  { %v2335_v37 = vadd.f32 1.0, %v3658_v5 }
 0x5f5   :  { %v3660_v38 = vpop.eup %3659 }
 0x5f6   :  { %v2336_v39 = vmul.f32 0.5, %v2335_v37  ;;  %v2339_v40 = vadd.f32 1.0, %v3660_v38  ;;  %v3662_v41 = vpop.eup %3661 }
 0x5f7   :  { %v3664_v47 = vpop.eup %3663 }
 0x5f8   :  { %v2340_v63 = vmul.f32 0.5, %v2339_v40  ;;  %v2348_v43 = vmul.f32 %v3662_v41, %v2336_v39  ;;  %v2344_v48 = vadd.f32 1.0, %v3664_v47 }
 0x5fa   :  { %v2347_v45 = vmul.f32 %v2340_v63, %v4326_v42  ;;  %v2345_v32 = vmul.f32 0.5, %v2344_v48 }
 0x5fc   :  { %v4368_v46 = vadd.f32 %v2348_v43, %v2347_v45  ;;  %v4468_v43 = vld [vmem:[#allocation36_spill] sm:$0xff] }
 0x5fe   :  { %3665 = vtanh.f32 %v4368_v46 }
 0x60b   :  { %v3666_v49 = vpop.eup %3665 }
 0x60c   :  { %v2351_v50 = vmul.f32 %v3666_v49, %v2345_v32  ;;  %v4469_v32 = vld [vmem:[#allocation37_spill] sm:$0xff] }
 0x60e   :  { %v2362_v51 = vpack.c.bf16 %v2351_v50, %v2351_v50 }
 0x610   :  { %2588 = vmatmul.mubr.bf16.vlgmr.msra.gmra.mxu0 %v2362_v51  ;;  %2629 = vmatmul.mubr.bf16.vlgmr.msra.gmra.mxu1 %v2362_v51 }
 0x611   :  { %2864 = vmatpush1.bf16.msra.mxu0 %v4185_v6  ;;  %2905 = vmatpush1.bf16.msra.mxu1 %v4187_v27  ;;  %v4463_v27 = vld [vmem:[#allocation31_spill] sm:$0xff] }
 0x612   :  { %2865 = vmatprep.subr.bf16.mxu0 %v4193_v17  ;;  %2906 = vmatprep.subr.bf16.mxu1 %v4195_v23 }
 0x613   :  { %2895 = vmatprep.mubr.bf16.mxu0 %v4450_v21  ;;  %2936 = vmatprep.mubr.bf16.mxu1 %v4450_v21 }
 0x615   :  { %2866 = vmatpush1.bf16.msra.mxu0 %v4197_v53  ;;  %2907 = vmatpush1.bf16.msra.mxu1 %v4199_v11 }
 0x616   :  { %2867 = vmatprep.subr.bf16.mxu0 %v4205_v10  ;;  %2908 = vmatprep.subr.bf16.mxu1 %v4207_v7  ;;  %v4464_v10 = vld [vmem:[#allocation33_spill] sm:$0xff] }
 0x619   :  { %2868 = vmatpush1.bf16.msra.mxu0 %v4209_v22  ;;  %2909 = vmatpush1.bf16.msra.mxu1 %v4211_v8 }
 0x61a   :  { %2869 = vmatprep.subr.bf16.mxu0 %v4217_v14  ;;  %2910 = vmatprep.subr.bf16.mxu1 %v4219_v33  ;;  %v4465_v14 = vld [vmem:[#allocation32_spill] sm:$0xff] }
 0x61d   :  { %2870 = vmatpush1.bf16.msra.mxu0 %v4221_v34  ;;  %2911 = vmatpush1.bf16.msra.mxu1 %v4223_v15 }
 0x61e   :  { %2871 = vmatprep.subr.bf16.mxu0 %v4229_v24  ;;  %2912 = vmatprep.subr.bf16.mxu1 %v4231_v16  ;;  %v4466_v16 = vld [vmem:[#allocation34_spill] sm:$0xff] }
 0x621   :  { %2872 = vmatpush1.bf16.msra.mxu0 %v4233_v0  ;;  %2913 = vmatpush1.bf16.msra.mxu1 %v4235_v9 }
 0x622   :  { %2873 = vmatprep.subr.bf16.mxu0 %v4241_v28  ;;  %2914 = vmatprep.subr.bf16.mxu1 %v4243_v18 }
 0x625   :  { %2874 = vmatpush1.bf16.msra.mxu0 %v4245_v20  ;;  %2915 = vmatpush1.bf16.msra.mxu1 %v4247_v44 }
 0x626   :  { %2875 = vmatprep.subr.bf16.mxu0 %v4253_v25  ;;  %2916 = vmatprep.subr.bf16.mxu1 %v4255_v12 }
 0x629   :  { %2876 = vmatpush1.bf16.msra.mxu0 %v4257_v13  ;;  %2917 = vmatpush1.bf16.msra.mxu1 %v4259_v19 }
 0x62a   :  { %2877 = vmatprep.subr.bf16.mxu0 %v4265_v29  ;;  %2918 = vmatprep.subr.bf16.mxu1 %v4267_v26 }
 0x62d   :  { %2878 = vmatpush1.bf16.msra.mxu0 %v4269_v30  ;;  %2919 = vmatpush1.bf16.msra.mxu1 %v4271_v36 }
 0x62e   :  { %3418 = vmatprep.subr.bf16.mxu0 %v3805_v57 }
 0x6d0   :  { %v2589_v21 = vpop.f32.mrf.mxu0  ;;  %v2630_v6 = vpop.f32.mrf.mxu1 }
 0x6d1   :  { %v2637_v17 = vadd.f32 %v2589_v21, %v4463_v27  ;;  %v2639_v33 = vadd.f32 %v2630_v6, %v4465_v14 }
 0x6d2   :  { %v2591_v23 = vpop.f32.mrf.mxu0  ;;  %v2632_v53 = vpop.f32.mrf.mxu1 }
 0x6d3   :  { %v2641_v11 = vmul.f32 0.5, %v2637_v17  ;;  %v2638_v7 = vadd.f32 %v2591_v23, %v4464_v10  ;;  %v2640_v0 = vadd.f32 %v2632_v53, %v4466_v16 }
 0x6d4   :  { %v2593_v22 = vpop.f32.mrf.mxu0  ;;  %v2634_v8 = vpop.f32.mrf.mxu1 }
 0x6d5   :  { %3667 = vtanh.f32 %v2641_v11  ;;  %v2645_v34 = vmul.f32 0.5, %v2638_v7  ;;  %v2650_v9 = vmul.f32 0.5, %v2640_v0 }
 0x6d6   :  { %v2594_v15 = vpop.f32.mrf.mxu0  ;;  %v2635_v24 = vpop.f32.mrf.mxu1 }
 0x6d7   :  { %3669 = vtanh.f32 %v2645_v34  ;;  %v3400_v15 = vld [vmem:[%s4427_s5] ss:$0 sm:$0xff] }
 0x6d8   :  { %3671 = vtanh.f32 %v2639_v33 }
 0x6d9   :  { %3673 = vtanh.f32 %v2650_v9 }
 0x6e2   :  { %v3668_v28 = vpop.eup %3667 }
 0x6e3   :  { %v2643_v18 = vadd.f32 1.0, %v3668_v28 }
 0x6e4   :  { %v3670_v20 = vpop.eup %3669 }
 0x6e5   :  { %v2644_v44 = vmul.f32 0.5, %v2643_v18  ;;  %v2647_v25 = vadd.f32 1.0, %v3670_v20  ;;  %v3672_v12 = vpop.eup %3671 }
 0x6e6   :  { %v3674_v30 = vpop.eup %3673 }
 0x6e7   :  { %v2648_v13 = vmul.f32 0.5, %v2647_v25  ;;  %v2656_v19 = vmul.f32 %v3672_v12, %v2644_v44  ;;  %v2652_v36 = vadd.f32 1.0, %v3674_v30 }
 0x6e9   :  { %v2655_v29 = vmul.f32 %v2648_v13, %v4368_v46  ;;  %v2653_v42 = vmul.f32 0.5, %v2652_v36 }
 0x6eb   :  { %v4408_v26 = vadd.f32 %v2656_v19, %v2655_v29 }
 0x6ed   :  { %3675 = vtanh.f32 %v4408_v26 }
 0x6fa   :  { %v3676_v52 = vpop.eup %3675 }
 0x6fb   :  { %v2659_v54 = vmul.f32 %v3676_v52, %v2653_v42 }
 0x6fd   :  { %v2670_v55 = vpack.c.bf16 %v2659_v54, %v2659_v54 }
 0x6ff   :  { %2896 = vmatmul.mubr.bf16.vlgmr.msra.gmra.mxu0 %v2670_v55  ;;  %2937 = vmatmul.mubr.bf16.vlgmr.msra.gmra.mxu1 %v2670_v55 }
 0x700   :  { %3419 = vmatpush3.bf16.msra.mxu0 %v3599_v56  ;;  %3434 = vmatprep.mubr.msk.bf16.mxu0 %vm3806_vm0, %v3805_v57 }
 0x701   :  { %3420 = vmatprep.subr.bf16.mxu0 %v3805_v57 }
 0x704   :  { %3421 = vmatpush3.bf16.msra.mxu0 %v3600_v58 }
 0x705   :  { %3422 = vmatprep.subr.bf16.mxu0 %v3805_v57 }
 0x708   :  { %3423 = vmatpush3.bf16.msra.mxu0 %v3601_v59 }
 0x709   :  { %3424 = vmatprep.subr.bf16.mxu0 %v3805_v57 }
 0x70c   :  { %3425 = vmatpush3.bf16.msra.mxu0 %v3602_v60 }
 0x70d   :  { %3426 = vmatprep.subr.bf16.mxu0 %v3805_v57 }
 0x710   :  { %3427 = vmatpush3.bf16.msra.mxu0 %v3603_v61 }
 0x711   :  { %3428 = vmatprep.subr.bf16.mxu0 %v3805_v57 }
 0x714   :  { %3429 = vmatpush3.bf16.msra.mxu0 %v3604_v1 }
 0x715   :  { %3430 = vmatprep.subr.bf16.mxu0 %v3805_v57 }
 0x718   :  { %3431 = vmatpush3.bf16.msra.mxu0 %v3605_v2 }
 0x719   :  { %3432 = vmatprep.subr.bf16.mxu0 %v3805_v57 }
 0x71c   :  { %3433 = vmatpush3.bf16.msra.mxu0 %v3606_v3 }
 0x7bf   :  { %v2897_v35 = vpop.f32.mrf.mxu0  ;;  %v2938_v62 = vpop.f32.mrf.mxu1 }
 0x7c0   :  { %v2945_v5 = vadd.f32 %v2897_v35, %v4467_v4  ;;  %v2947_v45 = vadd.f32 %v2938_v62, %v4468_v43 }
 0x7c1   :  { %v2899_v37 = vpop.f32.mrf.mxu0  ;;  %v2940_v38 = vpop.f32.mrf.mxu1 }
 0x7c2   :  { %v2949_v39 = vmul.f32 0.5, %v2945_v5  ;;  %v2946_v40 = vadd.f32 %v2899_v37, %v4084_v31  ;;  %v2948_v49 = vadd.f32 %v2940_v38, %v4469_v32 }
 0x7c3   :  { %v2901_v41 = vpop.f32.mrf.mxu0  ;;  %v2942_v63 = vpop.f32.mrf.mxu1 }
 0x7c4   :  { %3677 = vtanh.f32 %v2949_v39  ;;  %v2953_v46 = vmul.f32 0.5, %v2946_v40  ;;  %v2958_v50 = vmul.f32 0.5, %v2948_v49 }
 0x7c5   :  { %v2902_v47 = vpop.f32.mrf.mxu0  ;;  %v2943_v48 = vpop.f32.mrf.mxu1 }
 0x7c6   :  { %3679 = vtanh.f32 %v2953_v46 }
 0x7c7   :  { %3681 = vtanh.f32 %v2947_v45 }
 0x7c8   :  { %3683 = vtanh.f32 %v2958_v50 }
 0x7d1   :  { %v3678_v51 = vpop.eup %3677 }
 0x7d2   :  { %v2951_v21 = vadd.f32 1.0, %v3678_v51 }
 0x7d3   :  { %v3680_v6 = vpop.eup %3679 }
 0x7d4   :  { %v2952_v27 = vmul.f32 0.5, %v2951_v21  ;;  %v2955_v17 = vadd.f32 1.0, %v3680_v6  ;;  %v3682_v31 = vpop.eup %3681 }
 0x7d5   :  { %v3684_v7 = vpop.eup %3683 }
 0x7d6   :  { %v2956_v23 = vmul.f32 0.5, %v2955_v17  ;;  %v2964_v53 = vmul.f32 %v3682_v31, %v2952_v27  ;;  %v2960_v22 = vadd.f32 1.0, %v3684_v7 }
 0x7d8   :  { %v2963_v11 = vmul.f32 %v2956_v23, %v4408_v26  ;;  %v2961_v8 = vmul.f32 0.5, %v2960_v22 }
 0x7da   :  { %v2965_v10 = vadd.f32 %v2964_v53, %v2963_v11 }
 0x7dc   :  { %3685 = vtanh.f32 %v2965_v10 }
 0x7e9   :  { %v3686_v14 = vpop.eup %3685 }
 0x7ea   :  { %v2967_v33 = vmul.f32 %v3686_v14, %v2961_v8 }
 0x7ec   :  { %v2971_v34 = vpack.c.bf16 %v2967_v33, %v2967_v33 }
 0x7ee   :  { %3435 = vmatmul.mubr.bf16.vlgmr.msra.gmra.mxu0 %v2971_v34 }
 0x8ae   :  { %v3077_v24 = vpop.f32.mrf.mxu0 }
 0x8af   :  { %v3078_v16 = vadd.f32 %v3400_v15, %v3077_v24 }
 0x8b0   :  { %v3436_v0 = vpop.f32.mrf.mxu0 }
 0x8b1   :  { %3083 = vst [vmem:[#allocation14] sm:$0xff] %v3078_v16 }
 0x8b2   :  { %v3080_v9 = vpop.f32.mrf.mxu0 }
 0x8b3   :  { %3778 = shalt.err (!%p3775_p10)
}
 0x8b4   :  { %3093 = dma.vmem_to_hbm [thread:$0]  %s3091_s21, 128, %s4428_s6, [#allocation8]   ;;  %v3437_v28 = vpop.f32.mrf.mxu0 }
 0x8b5   :  { %3793 = dma.done.wait [#allocation8], 128  }
 0x8b6   :  { %3794 = vsyncadd [#allocation8], 4294967168 }
 0x8b7   :  { %3097 = vsyncpa [#allocation7], 1 }
 0x8b8   :  { %3098 = vsyncpa [#allocation10], 1 }
 0x8b9   :  { %3099 = vsyncpa [#allocation13], 1 }
 0x8ba   :  { %3100 = vsyncpa [#allocation8], 1 }

</bundles_post_ra>
